<compile_context>
chip_gen: v6e
topology: v6e:2x2x1
jax: 0.10.0
libtpu: 0.0.40
codegen_flags: <defaults>
</compile_context>

<pallas_src>
import functools

import jax
import jax.numpy as jnp
import numpy as np
from jax.experimental import pallas as pl
from jax.experimental.pallas import tpu as pltpu

DIMS = [28 * 28, 196, 98, 49, 10, 49, 98, 196, 28 * 28]   # real feature dims
N_LAYERS = len(DIMS) - 1                                   # 8 linear layers


def _round_up(x, m):
    return ((x + m - 1) // m) * m


# Interface dims (input / output) stay at their real 784 so the kernel touches
# the caller's arrays directly. Interior dims padded to 128-lane multiples.
PD = [DIMS[0]] + [_round_up(d, 128) for d in DIMS[1:-1]] + [DIMS[-1]]
# -> [784, 256, 128, 128, 128, 128, 128, 256, 784]


def mlp_kernel(x_ref, *refs):
    """Fused 8-layer MLP for one batch tile. refs = (w1,b1,...,w8,b8, o_ref)."""
    o_ref = refs[-1]
    p = refs[:-1]

    h = x_ref[...]                                      # (tb, 784)
    for i in range(N_LAYERS):                           # static unroll (LLO-visible)
        w = p[2 * i][...]                               # (PD[i], PD[i+1]) bf16
        b = p[2 * i + 1][...]                           # (1, PD[i+1])     f32
        h = jnp.dot(h.astype(jnp.bfloat16), w,
                    preferred_element_type=jnp.float32) + b
        if i < N_LAYERS - 1:
            h = jnp.maximum(h, 0.0)                     # ReLU in f32 (VPU)

    # h is (tb, 784): only real logits, so no padding mask is needed.
    # Numerically stable log_softmax along dim=1.
    m = jnp.max(h, axis=-1, keepdims=True)
    shifted = h - m
    lse = jnp.log(jnp.sum(jnp.exp(shifted), axis=-1, keepdims=True))
    o_ref[...] = (shifted - lse).astype(o_ref.dtype)


def prepare_params(params):
    """Pad interior dims with zeros and cast weights to bf16 ONCE (not per call)."""
    flat = []
    for li, (w, b) in enumerate(params):
        pin, pout = PD[li], PD[li + 1]
        w_p = jnp.pad(w, ((0, pin - w.shape[0]), (0, pout - w.shape[1])))
        b_p = jnp.pad(b.reshape(1, -1), ((0, 0), (0, pout - b.shape[0])))
        flat += [w_p.astype(jnp.bfloat16), b_p.astype(jnp.float32)]
    return tuple(flat)


def _tiling(batch, tb_max):
    # >= 2 grid steps when the batch allows it, so the "parallel" batch axis
    # shards across both TensorCores on v7x; tb is a multiple of 8 sublanes.
    steps = max(pl.cdiv(batch, tb_max), 2 if batch >= 16 else 1)
    tb = _round_up(pl.cdiv(batch, steps), 8)
    return tb, steps


@functools.partial(jax.jit, static_argnames=("tb_max",))
def neural_net_forward(x, flat_params, *, tb_max=512):
    """x: (batch, 784) f32 (or bf16); flat_params: output of prepare_params."""
    batch, d_in = x.shape
    assert d_in == DIMS[0]

    tb, steps = _tiling(batch, tb_max)
    b_pad = tb * steps
    x_in = x if b_pad == batch else jnp.pad(x, ((0, b_pad - batch), (0, 0)))

    in_specs = [pl.BlockSpec((tb, DIMS[0]), lambda i: (i, 0))]
    for li in range(N_LAYERS):
        # Constant block index -> weights/biases stay VMEM-resident across steps.
        in_specs += [pl.BlockSpec((PD[li], PD[li + 1]), lambda i: (0, 0)),
                     pl.BlockSpec((1, PD[li + 1]), lambda i: (0, 0))]

    flops = 2 * b_pad * sum(PD[i] * PD[i + 1] for i in range(N_LAYERS))
    weight_bytes = sum(int(np.prod(a.shape)) * a.dtype.itemsize for a in flat_params)
    bytes_accessed = (weight_bytes
                      + b_pad * DIMS[0] * x_in.dtype.itemsize
                      + b_pad * DIMS[-1] * 4)

    out = pl.pallas_call(
        mlp_kernel,
        out_shape=jax.ShapeDtypeStruct((b_pad, DIMS[-1]), jnp.float32),
        grid=(steps,),
        in_specs=in_specs,
        out_specs=pl.BlockSpec((tb, DIMS[-1]), lambda i: (i, 0)),
        compiler_params=pltpu.CompilerParams(
            dimension_semantics=("parallel",),
            vmem_limit_bytes=48 * 1024 * 1024,   # <= 64 MiB physical on v7x
        ),
        cost_estimate=pl.CostEstimate(
            flops=flops,
            transcendentals=b_pad * DIMS[-1],
            bytes_accessed=bytes_accessed,
        ),
    )(x_in, *flat_params)

    return out if b_pad == batch else out[:batch]


def init_params(key):
    """Deterministic init matching nn.Linear's default U(-1/sqrt(fan_in), +)."""
    params = []
    for i in range(N_LAYERS):
        fan_in, fan_out = DIMS[i], DIMS[i + 1]
        key, kw, kb = jax.random.split(key, 3)
        bound = 1.0 / np.sqrt(fan_in)
        w = jax.random.uniform(kw, (fan_in, fan_out), jnp.float32, -bound, bound)
        b = jax.random.uniform(kb, (fan_out,), jnp.float32, -bound, bound)
        params.append((w, b))
    return params


def reference_forward(x, params):
    """Pure-JAX reference mirroring the kernel math (bf16 MXU operands, f32 acc)."""
    h = x
    for i, (w, b) in enumerate(params):
        h = jnp.dot(h.astype(jnp.bfloat16), w.astype(jnp.bfloat16),
                    preferred_element_type=jnp.float32) + b
        if i < N_LAYERS - 1:
            h = jnp.maximum(h, 0.0)
    return jax.nn.log_softmax(h, axis=1)


if __name__ == "__main__":
    key = jax.random.PRNGKey(0)
    key, kx = jax.random.split(key)
    batch = 16                       # -> tb=8, grid=(2,): exercises the 2-step path
    x = jax.random.normal(kx, (batch, 28 * 28), jnp.float32)

    params = init_params(key)
    flat_params = prepare_params(params)    # padded/bf16 weights built once

    out = jax.block_until_ready(neural_net_forward(x, flat_params))
    ref = jax.block_until_ready(reference_forward(x, params))

    assert out.shape == (batch, 28 * 28)
    np.testing.assert_allclose(np.asarray(out), np.asarray(ref), atol=2e-3, rtol=2e-3)

    print("KERNEL_OK")
</pallas_src>

<mosaic_0001>
module attributes {stable_mosaic.version = 11 : i64} {
  func.func @mlp_kernel(%arg0: i32, %arg1: memref<8x784xf32, #tpu.memory_space<vmem>>, %arg2: memref<784x256xbf16, #tpu.memory_space<vmem>>, %arg3: memref<1x256xf32, #tpu.memory_space<vmem>>, %arg4: memref<256x128xbf16, #tpu.memory_space<vmem>>, %arg5: memref<1x128xf32, #tpu.memory_space<vmem>>, %arg6: memref<128x128xbf16, #tpu.memory_space<vmem>>, %arg7: memref<1x128xf32, #tpu.memory_space<vmem>>, %arg8: memref<128x128xbf16, #tpu.memory_space<vmem>>, %arg9: memref<1x128xf32, #tpu.memory_space<vmem>>, %arg10: memref<128x128xbf16, #tpu.memory_space<vmem>>, %arg11: memref<1x128xf32, #tpu.memory_space<vmem>>, %arg12: memref<128x128xbf16, #tpu.memory_space<vmem>>, %arg13: memref<1x128xf32, #tpu.memory_space<vmem>>, %arg14: memref<128x256xbf16, #tpu.memory_space<vmem>>, %arg15: memref<1x256xf32, #tpu.memory_space<vmem>>, %arg16: memref<256x784xbf16, #tpu.memory_space<vmem>>, %arg17: memref<1x784xf32, #tpu.memory_space<vmem>>, %arg18: memref<8x784xf32, #tpu.memory_space<vmem>>) attributes {dimension_semantics = [#tpu.dimension_semantics<parallel>], iteration_bounds = array<i64: 2>, scalar_prefetch = 0 : i64, scratch_operands = 0 : i64, tpu.core_type = #tpu.core_type<tc>, window_params = [{transform_indices = @transform_0, window_bounds = array<i64: 8, 784>}, {pipeline_mode = #tpu.pipeline_mode<synchronous>, transform_indices = @transform_1, window_bounds = array<i64: 784, 256>}, {pipeline_mode = #tpu.pipeline_mode<synchronous>, transform_indices = @transform_2, window_bounds = array<i64: 1, 256>}, {pipeline_mode = #tpu.pipeline_mode<synchronous>, transform_indices = @transform_3, window_bounds = array<i64: 256, 128>}, {pipeline_mode = #tpu.pipeline_mode<synchronous>, transform_indices = @transform_4, window_bounds = array<i64: 1, 128>}, {pipeline_mode = #tpu.pipeline_mode<synchronous>, transform_indices = @transform_5, window_bounds = array<i64: 128, 128>}, {pipeline_mode = #tpu.pipeline_mode<synchronous>, transform_indices = @transform_6, window_bounds = array<i64: 1, 128>}, {pipeline_mode = #tpu.pipeline_mode<synchronous>, transform_indices = @transform_7, window_bounds = array<i64: 128, 128>}, {pipeline_mode = #tpu.pipeline_mode<synchronous>, transform_indices = @transform_8, window_bounds = array<i64: 1, 128>}, {pipeline_mode = #tpu.pipeline_mode<synchronous>, transform_indices = @transform_9, window_bounds = array<i64: 128, 128>}, {pipeline_mode = #tpu.pipeline_mode<synchronous>, transform_indices = @transform_10, window_bounds = array<i64: 1, 128>}, {pipeline_mode = #tpu.pipeline_mode<synchronous>, transform_indices = @transform_11, window_bounds = array<i64: 128, 128>}, {pipeline_mode = #tpu.pipeline_mode<synchronous>, transform_indices = @transform_12, window_bounds = array<i64: 1, 128>}, {pipeline_mode = #tpu.pipeline_mode<synchronous>, transform_indices = @transform_13, window_bounds = array<i64: 128, 256>}, {pipeline_mode = #tpu.pipeline_mode<synchronous>, transform_indices = @transform_14, window_bounds = array<i64: 1, 256>}, {pipeline_mode = #tpu.pipeline_mode<synchronous>, transform_indices = @transform_15, window_bounds = array<i64: 256, 784>}, {pipeline_mode = #tpu.pipeline_mode<synchronous>, transform_indices = @transform_16, window_bounds = array<i64: 1, 784>}, {transform_indices = @transform_17, window_bounds = array<i64: 8, 784>}]} {
    %c0 = arith.constant 0 : index
    %c0_0 = arith.constant 0 : index
    %0 = vector.load %arg1[%c0, %c0_0] : memref<8x784xf32, #tpu.memory_space<vmem>>, vector<8x784xf32>
    %c0_1 = arith.constant 0 : index
    %c0_2 = arith.constant 0 : index
    %1 = vector.load %arg2[%c0_1, %c0_2] : memref<784x256xbf16, #tpu.memory_space<vmem>>, vector<784x256xbf16>
    %c0_3 = arith.constant 0 : index
    %c0_4 = arith.constant 0 : index
    %2 = vector.load %arg3[%c0_3, %c0_4] : memref<1x256xf32, #tpu.memory_space<vmem>>, vector<1x256xf32>
    %3 = arith.truncf %0 : vector<8x784xf32> to vector<8x784xbf16>
    %cst = arith.constant dense<0.000000e+00> : vector<8x256xf32>
    %4 = tpu.matmul %3, %1, %cst {dimension_numbers = #tpu.dot_dimension_numbers<[1], [0], [0], [1], [0, 0, 1, 1], [], []>} : vector<8x784xbf16>, vector<784x256xbf16>, vector<8x256xf32> -> vector<8x256xf32>
    %5 = vector.broadcast %2 : vector<1x256xf32> to vector<8x256xf32>
    %6 = arith.addf %4, %5 : vector<8x256xf32>
    %cst_5 = arith.constant 0.000000e+00 : f32
    %7 = vector.broadcast %cst_5 : f32 to vector<8x256xf32>
    %8 = arith.maximumf %6, %7 : vector<8x256xf32>
    %c0_6 = arith.constant 0 : index
    %c0_7 = arith.constant 0 : index
    %9 = vector.load %arg4[%c0_6, %c0_7] : memref<256x128xbf16, #tpu.memory_space<vmem>>, vector<256x128xbf16>
    %c0_8 = arith.constant 0 : index
    %c0_9 = arith.constant 0 : index
    %10 = vector.load %arg5[%c0_8, %c0_9] : memref<1x128xf32, #tpu.memory_space<vmem>>, vector<1x128xf32>
    %11 = arith.truncf %8 : vector<8x256xf32> to vector<8x256xbf16>
    %cst_10 = arith.constant dense<0.000000e+00> : vector<8x128xf32>
    %12 = tpu.matmul %11, %9, %cst_10 {dimension_numbers = #tpu.dot_dimension_numbers<[1], [0], [0], [1], [0, 0, 1, 1], [], []>} : vector<8x256xbf16>, vector<256x128xbf16>, vector<8x128xf32> -> vector<8x128xf32>
    %13 = vector.broadcast %10 : vector<1x128xf32> to vector<8x128xf32>
    %14 = arith.addf %12, %13 : vector<8x128xf32>
    %cst_11 = arith.constant 0.000000e+00 : f32
    %15 = vector.broadcast %cst_11 : f32 to vector<8x128xf32>
    %16 = arith.maximumf %14, %15 : vector<8x128xf32>
    %c0_12 = arith.constant 0 : index
    %c0_13 = arith.constant 0 : index
    %17 = vector.load %arg6[%c0_12, %c0_13] : memref<128x128xbf16, #tpu.memory_space<vmem>>, vector<128x128xbf16>
    %c0_14 = arith.constant 0 : index
    %c0_15 = arith.constant 0 : index
    %18 = vector.load %arg7[%c0_14, %c0_15] : memref<1x128xf32, #tpu.memory_space<vmem>>, vector<1x128xf32>
    %19 = arith.truncf %16 : vector<8x128xf32> to vector<8x128xbf16>
    %cst_16 = arith.constant dense<0.000000e+00> : vector<8x128xf32>
    %20 = tpu.matmul %19, %17, %cst_16 {dimension_numbers = #tpu.dot_dimension_numbers<[1], [0], [0], [1], [0, 0, 1, 1], [], []>} : vector<8x128xbf16>, vector<128x128xbf16>, vector<8x128xf32> -> vector<8x128xf32>
    %21 = vector.broadcast %18 : vector<1x128xf32> to vector<8x128xf32>
    %22 = arith.addf %20, %21 : vector<8x128xf32>
    %cst_17 = arith.constant 0.000000e+00 : f32
    %23 = vector.broadcast %cst_17 : f32 to vector<8x128xf32>
    %24 = arith.maximumf %22, %23 : vector<8x128xf32>
    %c0_18 = arith.constant 0 : index
    %c0_19 = arith.constant 0 : index
    %25 = vector.load %arg8[%c0_18, %c0_19] : memref<128x128xbf16, #tpu.memory_space<vmem>>, vector<128x128xbf16>
    %c0_20 = arith.constant 0 : index
    %c0_21 = arith.constant 0 : index
    %26 = vector.load %arg9[%c0_20, %c0_21] : memref<1x128xf32, #tpu.memory_space<vmem>>, vector<1x128xf32>
    %27 = arith.truncf %24 : vector<8x128xf32> to vector<8x128xbf16>
    %cst_22 = arith.constant dense<0.000000e+00> : vector<8x128xf32>
    %28 = tpu.matmul %27, %25, %cst_22 {dimension_numbers = #tpu.dot_dimension_numbers<[1], [0], [0], [1], [0, 0, 1, 1], [], []>} : vector<8x128xbf16>, vector<128x128xbf16>, vector<8x128xf32> -> vector<8x128xf32>
    %29 = vector.broadcast %26 : vector<1x128xf32> to vector<8x128xf32>
    %30 = arith.addf %28, %29 : vector<8x128xf32>
    %cst_23 = arith.constant 0.000000e+00 : f32
    %31 = vector.broadcast %cst_23 : f32 to vector<8x128xf32>
    %32 = arith.maximumf %30, %31 : vector<8x128xf32>
    %c0_24 = arith.constant 0 : index
    %c0_25 = arith.constant 0 : index
    %33 = vector.load %arg10[%c0_24, %c0_25] : memref<128x128xbf16, #tpu.memory_space<vmem>>, vector<128x128xbf16>
    %c0_26 = arith.constant 0 : index
    %c0_27 = arith.constant 0 : index
    %34 = vector.load %arg11[%c0_26, %c0_27] : memref<1x128xf32, #tpu.memory_space<vmem>>, vector<1x128xf32>
    %35 = arith.truncf %32 : vector<8x128xf32> to vector<8x128xbf16>
    %cst_28 = arith.constant dense<0.000000e+00> : vector<8x128xf32>
    %36 = tpu.matmul %35, %33, %cst_28 {dimension_numbers = #tpu.dot_dimension_numbers<[1], [0], [0], [1], [0, 0, 1, 1], [], []>} : vector<8x128xbf16>, vector<128x128xbf16>, vector<8x128xf32> -> vector<8x128xf32>
    %37 = vector.broadcast %34 : vector<1x128xf32> to vector<8x128xf32>
    %38 = arith.addf %36, %37 : vector<8x128xf32>
    %cst_29 = arith.constant 0.000000e+00 : f32
    %39 = vector.broadcast %cst_29 : f32 to vector<8x128xf32>
    %40 = arith.maximumf %38, %39 : vector<8x128xf32>
    %c0_30 = arith.constant 0 : index
    %c0_31 = arith.constant 0 : index
    %41 = vector.load %arg12[%c0_30, %c0_31] : memref<128x128xbf16, #tpu.memory_space<vmem>>, vector<128x128xbf16>
    %c0_32 = arith.constant 0 : index
    %c0_33 = arith.constant 0 : index
    %42 = vector.load %arg13[%c0_32, %c0_33] : memref<1x128xf32, #tpu.memory_space<vmem>>, vector<1x128xf32>
    %43 = arith.truncf %40 : vector<8x128xf32> to vector<8x128xbf16>
    %cst_34 = arith.constant dense<0.000000e+00> : vector<8x128xf32>
    %44 = tpu.matmul %43, %41, %cst_34 {dimension_numbers = #tpu.dot_dimension_numbers<[1], [0], [0], [1], [0, 0, 1, 1], [], []>} : vector<8x128xbf16>, vector<128x128xbf16>, vector<8x128xf32> -> vector<8x128xf32>
    %45 = vector.broadcast %42 : vector<1x128xf32> to vector<8x128xf32>
    %46 = arith.addf %44, %45 : vector<8x128xf32>
    %cst_35 = arith.constant 0.000000e+00 : f32
    %47 = vector.broadcast %cst_35 : f32 to vector<8x128xf32>
    %48 = arith.maximumf %46, %47 : vector<8x128xf32>
    %c0_36 = arith.constant 0 : index
    %c0_37 = arith.constant 0 : index
    %49 = vector.load %arg14[%c0_36, %c0_37] : memref<128x256xbf16, #tpu.memory_space<vmem>>, vector<128x256xbf16>
    %c0_38 = arith.constant 0 : index
    %c0_39 = arith.constant 0 : index
    %50 = vector.load %arg15[%c0_38, %c0_39] : memref<1x256xf32, #tpu.memory_space<vmem>>, vector<1x256xf32>
    %51 = arith.truncf %48 : vector<8x128xf32> to vector<8x128xbf16>
    %cst_40 = arith.constant dense<0.000000e+00> : vector<8x256xf32>
    %52 = tpu.matmul %51, %49, %cst_40 {dimension_numbers = #tpu.dot_dimension_numbers<[1], [0], [0], [1], [0, 0, 1, 1], [], []>} : vector<8x128xbf16>, vector<128x256xbf16>, vector<8x256xf32> -> vector<8x256xf32>
    %53 = vector.broadcast %50 : vector<1x256xf32> to vector<8x256xf32>
    %54 = arith.addf %52, %53 : vector<8x256xf32>
    %cst_41 = arith.constant 0.000000e+00 : f32
    %55 = vector.broadcast %cst_41 : f32 to vector<8x256xf32>
    %56 = arith.maximumf %54, %55 : vector<8x256xf32>
    %c0_42 = arith.constant 0 : index
    %c0_43 = arith.constant 0 : index
    %57 = vector.load %arg16[%c0_42, %c0_43] : memref<256x784xbf16, #tpu.memory_space<vmem>>, vector<256x784xbf16>
    %c0_44 = arith.constant 0 : index
    %c0_45 = arith.constant 0 : index
    %58 = vector.load %arg17[%c0_44, %c0_45] : memref<1x784xf32, #tpu.memory_space<vmem>>, vector<1x784xf32>
    %59 = arith.truncf %56 : vector<8x256xf32> to vector<8x256xbf16>
    %cst_46 = arith.constant dense<0.000000e+00> : vector<8x784xf32>
    %60 = tpu.matmul %59, %57, %cst_46 {dimension_numbers = #tpu.dot_dimension_numbers<[1], [0], [0], [1], [0, 0, 1, 1], [], []>} : vector<8x256xbf16>, vector<256x784xbf16>, vector<8x784xf32> -> vector<8x784xf32>
    %61 = vector.broadcast %58 : vector<1x784xf32> to vector<8x784xf32>
    %62 = arith.addf %60, %61 : vector<8x784xf32>
    %cst_47 = arith.constant dense<0xFF800000> : vector<8xf32>
    %63 = vector.multi_reduction <maximumf>, %62, %cst_47 [1] : vector<8x784xf32> to vector<8xf32>
    %64 = vector.shape_cast %63 : vector<8xf32> to vector<8x1xf32>
    %65 = vector.broadcast %64 : vector<8x1xf32> to vector<8x784xf32>
    %66 = arith.subf %62, %65 : vector<8x784xf32>
    %67 = math.exp %66 : vector<8x784xf32>
    %cst_48 = arith.constant dense<0.000000e+00> : vector<8xf32>
    %68 = vector.multi_reduction <add>, %67, %cst_48 [1] : vector<8x784xf32> to vector<8xf32>
    %69 = vector.shape_cast %68 : vector<8xf32> to vector<8x1xf32>
    %70 = math.log %69 : vector<8x1xf32>
    %71 = vector.broadcast %70 : vector<8x1xf32> to vector<8x784xf32>
    %72 = arith.subf %66, %71 : vector<8x784xf32>
    %c0_49 = arith.constant 0 : index
    %c0_50 = arith.constant 0 : index
    %73 = vector.load %arg18[%c0_49, %c0_50] : memref<8x784xf32, #tpu.memory_space<vmem>>, vector<8x784xf32>
    tpu.vector_store %arg18[%c0_49, %c0_50], %72 {strides = array<i32>} : memref<8x784xf32, #tpu.memory_space<vmem>>, vector<8x784xf32>,
    return
  }
  func.func @transform_0(%arg0: i32) -> (i32, i32) {
    %c0_i32 = arith.constant 0 : i32
    %c0_i32_0 = arith.constant 0 : i32
    return %arg0, %c0_i32 : i32, i32
  }
  func.func @transform_1(%arg0: i32) -> (i32, i32) {
    %c0_i32 = arith.constant 0 : i32
    %c0_i32_0 = arith.constant 0 : i32
    %c0_i32_1 = arith.constant 0 : i32
    return %c0_i32, %c0_i32_0 : i32, i32
  }
  func.func @transform_2(%arg0: i32) -> (i32, i32) {
    %c0_i32 = arith.constant 0 : i32
    %c0_i32_0 = arith.constant 0 : i32
    %c0_i32_1 = arith.constant 0 : i32
    return %c0_i32, %c0_i32_0 : i32, i32
  }
  func.func @transform_3(%arg0: i32) -> (i32, i32) {
    %c0_i32 = arith.constant 0 : i32
    %c0_i32_0 = arith.constant 0 : i32
    %c0_i32_1 = arith.constant 0 : i32
    return %c0_i32, %c0_i32_0 : i32, i32
  }
  func.func @transform_4(%arg0: i32) -> (i32, i32) {
    %c0_i32 = arith.constant 0 : i32
    %c0_i32_0 = arith.constant 0 : i32
    %c0_i32_1 = arith.constant 0 : i32
    return %c0_i32, %c0_i32_0 : i32, i32
  }
  func.func @transform_5(%arg0: i32) -> (i32, i32) {
    %c0_i32 = arith.constant 0 : i32
    %c0_i32_0 = arith.constant 0 : i32
    %c0_i32_1 = arith.constant 0 : i32
    return %c0_i32, %c0_i32_0 : i32, i32
  }
  func.func @transform_6(%arg0: i32) -> (i32, i32) {
    %c0_i32 = arith.constant 0 : i32
    %c0_i32_0 = arith.constant 0 : i32
    %c0_i32_1 = arith.constant 0 : i32
    return %c0_i32, %c0_i32_0 : i32, i32
  }
  func.func @transform_7(%arg0: i32) -> (i32, i32) {
    %c0_i32 = arith.constant 0 : i32
    %c0_i32_0 = arith.constant 0 : i32
    %c0_i32_1 = arith.constant 0 : i32
    return %c0_i32, %c0_i32_0 : i32, i32
  }
  func.func @transform_8(%arg0: i32) -> (i32, i32) {
    %c0_i32 = arith.constant 0 : i32
    %c0_i32_0 = arith.constant 0 : i32
    %c0_i32_1 = arith.constant 0 : i32
    return %c0_i32, %c0_i32_0 : i32, i32
  }
  func.func @transform_9(%arg0: i32) -> (i32, i32) {
    %c0_i32 = arith.constant 0 : i32
    %c0_i32_0 = arith.constant 0 : i32
    %c0_i32_1 = arith.constant 0 : i32
    return %c0_i32, %c0_i32_0 : i32, i32
  }
  func.func @transform_10(%arg0: i32) -> (i32, i32) {
    %c0_i32 = arith.constant 0 : i32
    %c0_i32_0 = arith.constant 0 : i32
    %c0_i32_1 = arith.constant 0 : i32
    return %c0_i32, %c0_i32_0 : i32, i32
  }
  func.func @transform_11(%arg0: i32) -> (i32, i32) {
    %c0_i32 = arith.constant 0 : i32
    %c0_i32_0 = arith.constant 0 : i32
    %c0_i32_1 = arith.constant 0 : i32
    return %c0_i32, %c0_i32_0 : i32, i32
  }
  func.func @transform_12(%arg0: i32) -> (i32, i32) {
    %c0_i32 = arith.constant 0 : i32
    %c0_i32_0 = arith.constant 0 : i32
    %c0_i32_1 = arith.constant 0 : i32
    return %c0_i32, %c0_i32_0 : i32, i32
  }
  func.func @transform_13(%arg0: i32) -> (i32, i32) {
    %c0_i32 = arith.constant 0 : i32
    %c0_i32_0 = arith.constant 0 : i32
    %c0_i32_1 = arith.constant 0 : i32
    return %c0_i32, %c0_i32_0 : i32, i32
  }
  func.func @transform_14(%arg0: i32) -> (i32, i32) {
    %c0_i32 = arith.constant 0 : i32
    %c0_i32_0 = arith.constant 0 : i32
    %c0_i32_1 = arith.constant 0 : i32
    return %c0_i32, %c0_i32_0 : i32, i32
  }
  func.func @transform_15(%arg0: i32) -> (i32, i32) {
    %c0_i32 = arith.constant 0 : i32
    %c0_i32_0 = arith.constant 0 : i32
    %c0_i32_1 = arith.constant 0 : i32
    return %c0_i32, %c0_i32_0 : i32, i32
  }
  func.func @transform_16(%arg0: i32) -> (i32, i32) {
    %c0_i32 = arith.constant 0 : i32
    %c0_i32_0 = arith.constant 0 : i32
    %c0_i32_1 = arith.constant 0 : i32
    return %c0_i32, %c0_i32_0 : i32, i32
  }
  func.func @transform_17(%arg0: i32) -> (i32, i32) {
    %c0_i32 = arith.constant 0 : i32
    %c0_i32_0 = arith.constant 0 : i32
    return %arg0, %c0_i32 : i32, i32
  }
}

</mosaic_0001>

<bundles_post_ra>
// kernel: neural_net_forward.1
= control target key start
LH: loop header
LB: loop body
LE: loop exit
PB: predicated region body
PF: predicated region fallthrough
CT: control target
= control target key end

     0   :  { %s5218_s0 = inlined_call_operand.vmem [shape: f32[16,784], index: 0, kind: input, shape index: {}]   ;;  %s5219_s1 = inlined_call_operand.vmem [shape: bf16[784,256], index: 1, kind: input, shape index: {}]   ;;  %s5220_s2 = inlined_call_operand.vmem [shape: f32[1,256], index: 2, kind: input, shape index: {}]   ;;  %s5221_s3 = inlined_call_operand.vmem [shape: bf16[256,128], index: 3, kind: input, shape index: {}]   ;;  %s5222_s4 = inlined_call_operand.vmem [shape: f32[1,128], index: 4, kind: input, shape index: {}]   ;;  %s5223_s5 = inlined_call_operand.vmem [shape: bf16[128,128], index: 5, kind: input, shape index: {}]   ;;  %s5224_s6 = inlined_call_operand.vmem [shape: f32[1,128], index: 6, kind: input, shape index: {}]   ;;  %s5225_s7 = inlined_call_operand.vmem [shape: bf16[128,128], index: 7, kind: input, shape index: {}]   ;;  %s5226_s8 = inlined_call_operand.vmem [shape: f32[1,128], index: 8, kind: input, shape index: {}]   ;;  %s5227_s9 = inlined_call_operand.vmem [shape: bf16[128,128], index: 9, kind: input, shape index: {}]   ;;  %s5228_s10 = inlined_call_operand.vmem [shape: f32[1,128], index: 10, kind: input, shape index: {}]   ;;  %s5229_s11 = inlined_call_operand.vmem [shape: bf16[128,128], index: 11, kind: input, shape index: {}]   ;;  %s5230_s12 = inlined_call_operand.vmem [shape: f32[1,128], index: 12, kind: input, shape index: {}]   ;;  %s5231_s13 = inlined_call_operand.vmem [shape: bf16[128,256], index: 13, kind: input, shape index: {}]   ;;  %s5232_s14 = inlined_call_operand.vmem [shape: f32[1,256], index: 14, kind: input, shape index: {}]   ;;  %s5233_s15 = inlined_call_operand.vmem [shape: bf16[256,784], index: 15, kind: input, shape index: {}]   ;;  %s5234_s16 = inlined_call_operand.vmem [shape: f32[1,784], index: 16, kind: input, shape index: {}]   ;;  %s5235_s17 = inlined_call_operand.hbm [shape: f32[16,784], index: 17, kind: output, shape index: {}]  }
   0x1   :  { %5244 = sst [smem:[#allocation11_spill]] %s5218_s0 }
   0x2   :  { %5245 = sst [smem:[#allocation12_spill]] %s5219_s1 }
   0x3   :  { %5246 = sst [smem:[#allocation13_spill]] %s5235_s17 }
   0x4   :  { %22 = vsyncpa [#allocation3], 0 }
   0x5   :  { %24 = vsyncpa [#allocation3 + $0x1], 0  ;;  %s4193_s24 = smov 0   ;;  %s4195_s25 = smov 0  }
   0x6   :  { %s4197_s26 = smov 0   ;;  %s4199_s27 = smov 0  }
   0x7 LB: > { %5247 = sst [smem:[#allocation5_spill]] %s4085_s24  ;;  %s4214_s28 = sadd.s32 4294967295, %s4097_s27   ;;  %s4097_s27 = sphi %s4199_s27, %s5261_s27   ;;  %s4093_s26 = sphi %s4197_s26, %s5263_s26   ;;  %s4089_s25 = sphi %s4195_s25, %s5265_s25   ;;  %s4085_s24 = sphi %s4193_s24, %s5264_s24  }
   0x8   : > { %5248 = sst [smem:[#allocation6_spill]] %s4093_s26  ;;  %s3149_s29 = sadd.s32 4294967294, %s4097_s27  }
   0x9   : > { %5249 = sst [smem:[#allocation7_spill]] %s4097_s27  ;;  %s4218_s0 = sadd.s32 1, %s4097_s27  }
   0xa   : > { %5250 = sst [smem:[#allocation8_spill]] %s4218_s0  ;;  %s399_s30 = sadd.s32 1, %s4093_s26 }
   0xb   : > { %s396_s18 = ssub.s32 %s4097_s27, %s4218_s0  ;;  %p409_p0 = scmp.ne.s32.totalorder %s4093_s26, %s4089_s25 }
   0xc   : > { %p397_p1 = scmp.eq.s32.totalorder %s396_s18, 0  ;;  %p410_p2 = scmp.eq.s32.totalorder %s4214_s28, 1 }
   0xd   : > { %p415_p3 = scmp.ne.s32.totalorder %s4089_s25, %s4085_s24  ;;  %p416_p4 = scmp.eq.s32.totalorder %s3149_s29, 1 }
   0xe   : > { %s4229_s19 = scalar_select %p397_p1, %s4093_s26, %s399_s30  }
   0xf   : > { %p4231_p5 = por %p410_p2, %p409_p0  ;;  %p4235_p6 = por %p416_p4, %p415_p3 }
  0x10   : > { %5251 = sst [smem:[#allocation9_spill]] %s4229_s19  ;;  %p3152_p7 = scmp.ge.s32.totalorder %s4097_s27, 1 }
  0x11   : > { %s5253_s20 = scalar_select %p4235_p6, 1, 0 }
  0x12   : > { %p490_p8 = scmp.lt.s32.totalorder %s4097_s27, 3 }
  0x13   : > { %5254 = sst [smem:[#allocation10_spill]] %s5253_s20 }
  0x14   : > { %p491_p9 = pnand %p3152_p7, %p490_p8 }
  0x15   : > { %s5255_s23 = sld [smem:[#allocation12_spill]] (!%p491_p9)  ;;  %p542_p10 = scmp.lt.s32.totalorder (!%p491_p9), %s4214_s28, 1 }
  0x16   : > { %494 = sbr.rel (%p491_p9) target bundleno = 2169 (0x879), region = 88  ;;  %s5256_s17 = sld [smem:[#allocation11_spill]] (!%p491_p9) }
  0x17   : > { %s5257_s19 = sld [smem:[#allocation13_spill]] (!%p491_p9) }
  0x1b   : > { %v3642_v0 = vld [vmem:[%s5255_s23 + $0x74] ss:$8 sps:$4 sm:$0xff]   ;;  %v3644_v1 = vld [vmem:[%s5255_s23 + $0x70] ss:$8 sps:$4 sm:$0xff]   ;;  %v3648_v4 = vld [vmem:[%s5255_s23 + $0x64] ss:$8 sps:$4 sm:$0xff]  }
  0x1c   : > { %1166 = vmatprep.subr.bf16.mxu0 %v3642_v0  ;;  %v3645_v2 = vld [vmem:[%s5255_s23 + $0x174] ss:$8 sps:$4 sm:$0xff]   ;;  %v3647_v3 = vld [vmem:[%s5255_s23 + $0x170] ss:$8 sps:$4 sm:$0xff]   ;;  %v3650_v5 = vld [vmem:[%s5255_s23 + $0x60] ss:$8 sps:$4 sm:$0xff]  }
  0x1d   : > { %1167 = vmatpush1.bf16.msra.mxu0 %v3644_v1  ;;  %1207 = vmatprep.subr.bf16.mxu1 %v3645_v2  ;;  %v3651_v6 = vld [vmem:[%s5255_s23 + $0x164] ss:$8 sps:$4 sm:$0xff]   ;;  %v3653_v7 = vld [vmem:[%s5255_s23 + $0x160] ss:$8 sps:$4 sm:$0xff]   ;;  %v3654_v8 = vld [vmem:[%s5255_s23 + $0x54] ss:$8 sps:$4 sm:$0xff]  }
  0x1e   : > { %1208 = vmatpush1.bf16.msra.mxu1 %v3647_v3  ;;  %1168 = vmatprep.subr.bf16.mxu0 %v3648_v4  ;;  %v3656_v9 = vld [vmem:[%s5255_s23 + $0x50] ss:$8 sps:$4 sm:$0xff]   ;;  %v3657_v10 = vld [vmem:[%s5255_s23 + $0x154] ss:$8 sps:$4 sm:$0xff]   ;;  %v3660_v11 = vld [vmem:[%s5255_s23 + $0x44] ss:$8 sps:$4 sm:$0xff]  }
  0x1f   : > { %1209 = vmatprep.subr.bf16.mxu1 %v3651_v6  ;;  %v3659_v12 = vld [vmem:[%s5255_s23 + $0x150] ss:$8 sps:$4 sm:$0xff]   ;;  %v3663_v13 = vld [vmem:[%s5255_s23 + $0x144] ss:$8 sps:$4 sm:$0xff]   ;;  %v3662_v14 = vld [vmem:[%s5255_s23 + $0x40] ss:$8 sps:$4 sm:$0xff]  }
  0x20   : > { %v3666_v15 = vld [vmem:[%s5255_s23 + $0x34] ss:$8 sps:$4 sm:$0xff]   ;;  %v3665_v16 = vld [vmem:[%s5255_s23 + $0x140] ss:$8 sps:$4 sm:$0xff]   ;;  %v3668_v18 = vld [vmem:[%s5255_s23 + $0x30] ss:$8 sps:$4 sm:$0xff]  }
  0x21   : > { %1169 = vmatpush1.bf16.msra.mxu0 %v3650_v5  ;;  %v3669_v17 = vld [vmem:[%s5255_s23 + $0x134] ss:$8 sps:$4 sm:$0xff]   ;;  %v3672_v19 = vld [vmem:[%s5255_s23 + $0x24] ss:$8 sps:$4 sm:$0xff]   ;;  %v3671_v20 = vld [vmem:[%s5255_s23 + $0x130] ss:$8 sps:$4 sm:$0xff]  }
  0x22   : > { %1170 = vmatprep.subr.bf16.mxu0 %v3654_v8  ;;  %1210 = vmatpush1.bf16.msra.mxu1 %v3653_v7  ;;  %v3675_v21 = vld [vmem:[%s5255_s23 + $0x124] ss:$8 sps:$4 sm:$0xff]   ;;  %v3674_v22 = vld [vmem:[%s5255_s23 + $0x20] ss:$8 sps:$4 sm:$0xff]   ;;  %v3678_v23 = vld [vmem:[%s5255_s23 + $0x14] ss:$8 sps:$4 sm:$0xff]  }
  0x23   : > { %1211 = vmatprep.subr.bf16.mxu1 %v3657_v10  ;;  %v3677_v24 = vld [vmem:[%s5255_s23 + $0x120] ss:$8 sps:$4 sm:$0xff]   ;;  %v3681_v25 = vld [vmem:[%s5255_s23 + $0x114] ss:$8 sps:$4 sm:$0xff]   ;;  %v3680_v26 = vld [vmem:[%s5255_s23 + $0x10] ss:$8 sps:$4 sm:$0xff]  }
  0x24   : > { %v3684_v27 = vld [vmem:[%s5255_s23 + $0x4] ss:$8 sps:$4 sm:$0xff]   ;;  %v3683_v28 = vld [vmem:[%s5255_s23 + $0x110] ss:$8 sps:$4 sm:$0xff]   ;;  %v3686_v30 = vld [vmem:[%s5255_s23] ss:$8 sps:$4 sm:$0xff]  }
  0x25   : > { %1171 = vmatpush1.bf16.msra.mxu0 %v3656_v9  ;;  %v3687_v29 = vld [vmem:[%s5255_s23 + $0x104] ss:$8 sps:$4 sm:$0xff]   ;;  %v3690_v31 = vld [vmem:[%s5255_s23 + $0xf4] ss:$8 sps:$4 sm:$0xff]   ;;  %v3689_v32 = vld [vmem:[%s5255_s23 + $0x100] ss:$8 sps:$4 sm:$0xff]  }
  0x26   : > { %1172 = vmatprep.subr.bf16.mxu0 %v3660_v11  ;;  %1212 = vmatpush1.bf16.msra.mxu1 %v3659_v12  ;;  %v3693_v33 = vld [vmem:[%s5255_s23 + $0x1f4] ss:$8 sps:$4 sm:$0xff]   ;;  %v3692_v34 = vld [vmem:[%s5255_s23 + $0xf0] ss:$8 sps:$4 sm:$0xff]   ;;  %s543_s21 = scalar_select %p542_p10, %s4214_s28, 1  ;;  %vm1162_vm0 = vcmask 130048  }
  0x27   : > { %1213 = vmatprep.subr.bf16.mxu1 %v3663_v13  ;;  %v3696_v35 = vld [vmem:[%s5255_s23 + $0xe4] ss:$8 sps:$4 sm:$0xff]   ;;  %v3695_v36 = vld [vmem:[%s5255_s23 + $0x1f0] ss:$8 sps:$4 sm:$0xff]   ;;  %v3698_v38 = vld [vmem:[%s5255_s23 + $0xe0] ss:$8 sps:$4 sm:$0xff]  }
  0x28   : > { %v3699_v37 = vld [vmem:[%s5255_s23 + $0x1e4] ss:$8 sps:$4 sm:$0xff]   ;;  %s3598_s20 = smul.u32 56, %s543_s21  ;;  %v3702_v39 = vld [vmem:[%s5255_s23 + $0xd4] ss:$8 sps:$4 sm:$0xff]   ;;  %vm4101_vm1 = vmmov 0  }
  0x29   : > { %1173 = vmatpush1.bf16.msra.mxu0 %v3662_v14  ;;  %v3701_v40 = vld [vmem:[%s5255_s23 + $0x1e0] ss:$8 sps:$4 sm:$0xff]   ;;  %v3705_v41 = vld [vmem:[%s5255_s23 + $0x1d4] ss:$8 sps:$4 sm:$0xff]   ;;  %v3704_v42 = vld [vmem:[%s5255_s23 + $0xd0] ss:$8 sps:$4 sm:$0xff]  }
  0x2a   : > { %1174 = vmatprep.subr.bf16.mxu0 %v3666_v15  ;;  %1214 = vmatpush1.bf16.msra.mxu1 %v3665_v16  ;;  %s4375_s27 = scalar_lea.vmem %s5256_s17, %s3598_s20  ;;  %v3708_v43 = vld [vmem:[%s5255_s23 + $0xc4] ss:$8 sps:$4 sm:$0xff]   ;;  %v3707_v44 = vld [vmem:[%s5255_s23 + $0x1d0] ss:$8 sps:$4 sm:$0xff]   ;;  %v3710_v47 = vld [vmem:[%s5255_s23 + $0xc0] ss:$8 sps:$4 sm:$0xff]  }
  0x2b   : > { %1215 = vmatprep.subr.bf16.mxu1 %v3669_v17  ;;  %v3711_v45 = vld [vmem:[%s5255_s23 + $0x1c4] ss:$8 sps:$4 sm:$0xff]   ;;  %v3714_v49 = vld [vmem:[%s5255_s23 + $0xb4] ss:$8 sps:$4 sm:$0xff]   ;;  %v3713_v51 = vld [vmem:[%s5255_s23 + $0x1c0] ss:$8 sps:$4 sm:$0xff]  }
  0x2c   : > { %v549_v46 = vld [vmem:[%s4375_s27 + $0x8] sm:$0xff]  ;;  %v551_v50 = vld [vmem:[%s4375_s27 + $0x18] sm:$0xff]  ;;  %v548_v4 = vld [vmem:[%s4375_s27] sm:$0xff]  ;;  %s539_s20 = sand.u32 1, %s4089_s25   ;;  %s3599_s21 = smul.u32 896, %s4214_s28 }
  0x2d   : > { %1175 = vmatpush1.bf16.msra.mxu0 %v3668_v18  ;;  %v655_v48 = vpack.c.bf16 %v549_v46, %v549_v46  ;;  %v657_v52 = vpack.c.bf16 %v551_v50, %v551_v50  ;;  %v3717_v53 = vld [vmem:[%s5255_s23 + $0x1b4] ss:$8 sps:$4 sm:$0xff]   ;;  %v3716_v54 = vld [vmem:[%s5255_s23 + $0xb0] ss:$8 sps:$4 sm:$0xff]   ;;  %v3720_v55 = vld [vmem:[%s5255_s23 + $0xa4] ss:$8 sps:$4 sm:$0xff]   ;;  %v654_v7 = vpack.c.bf16 %v548_v4, %v548_v4 }
  0x2e   : > { %1176 = vmatprep.subr.bf16.mxu0 %v3672_v19  ;;  %1216 = vmatpush1.bf16.msra.mxu1 %v3671_v20  ;;  %v3719_v56 = vld [vmem:[%s5255_s23 + $0x1b0] ss:$8 sps:$4 sm:$0xff]   ;;  %v3723_v57 = vld [vmem:[%s5255_s23 + $0x1a4] ss:$8 sps:$4 sm:$0xff]   ;;  %v3722_v58 = vld [vmem:[%s5255_s23 + $0xa0] ss:$8 sps:$4 sm:$0xff]   ;;  %s5176_s30 = scalar_lea.hbm %s5257_s19, %s3599_s21 }
  0x2f   : > { %1217 = vmatprep.subr.bf16.mxu1 %v3675_v21  ;;  %1198 = vmatprep.mubr.bf16.mxu0 %v655_v48  ;;  %v3726_v59 = vld [vmem:[%s5255_s23 + $0x94] ss:$8 sps:$4 sm:$0xff]   ;;  %v3725_v60 = vld [vmem:[%s5255_s23 + $0x1a0] ss:$8 sps:$4 sm:$0xff]   ;;  %v3728_v62 = vld [vmem:[%s5255_s23 + $0x90] ss:$8 sps:$4 sm:$0xff]  }
  0x30   : > { %1239 = vmatprep.mubr.bf16.mxu1 %v657_v52  ;;  %v3729_v61 = vld [vmem:[%s5255_s23 + $0x194] ss:$8 sps:$4 sm:$0xff]   ;;  %v3732_v63 = vld [vmem:[%s5255_s23 + $0x84] ss:$8 sps:$4 sm:$0xff]   ;;  %v3731_v0 = vld [vmem:[%s5255_s23 + $0x190] ss:$8 sps:$4 sm:$0xff]  }
  0x31   : > { %1177 = vmatpush1.bf16.msra.mxu0 %v3674_v22  ;;  %v3734_v1 = vld [vmem:[%s5255_s23 + $0x80] ss:$8 sps:$4 sm:$0xff]   ;;  %v3735_v2 = vld [vmem:[%s5255_s23 + $0x184] ss:$8 sps:$4 sm:$0xff]   ;;  %v3740_v5 = vld [vmem:[%s5255_s23 + $0x274] ss:$8 sps:$4 sm:$0xff]  }
  0x32   : > { %1178 = vmatprep.subr.bf16.mxu0 %v3678_v23  ;;  %1218 = vmatpush1.bf16.msra.mxu1 %v3677_v24  ;;  %v3737_v3 = vld [vmem:[%s5255_s23 + $0x180] ss:$8 sps:$4 sm:$0xff]   ;;  %v550_v6 = vld [vmem:[%s4375_s27 + $0x10] sm:$0xff]  ;;  %v3743_v9 = vld [vmem:[%s5255_s23 + $0x264] ss:$8 sps:$4 sm:$0xff]   ;;  %v4099_v19 = vmov 0  }
  0x33   : > { %1219 = vmatprep.subr.bf16.mxu1 %v3681_v25  ;;  %v3738_v8 = vld [vmem:[%s5255_s23 + $0x270] ss:$8 sps:$4 sm:$0xff]   ;;  %v656_v10 = vpack.c.bf16 %v550_v6, %v550_v6  ;;  %v3783_v11 = vld [vmem:[%s5255_s23 + $0x300] ss:$8 sps:$4 sm:$0xff]   ;;  %v3785_v12 = vld [vmem:[%s5255_s23 + $0x304] ss:$8 sps:$4 sm:$0xff]  }
  0x34   : > { %v3741_v13 = vld [vmem:[%s5255_s23 + $0x260] ss:$8 sps:$4 sm:$0xff]   ;;  %v3746_v14 = vld [vmem:[%s5255_s23 + $0x254] ss:$8 sps:$4 sm:$0xff]   ;;  %v3744_v18 = vld [vmem:[%s5255_s23 + $0x250] ss:$8 sps:$4 sm:$0xff]  }
  0x35   : > { %1179 = vmatpush1.bf16.msra.mxu0 %v3680_v26  ;;  %v554_v15 = vld [vmem:[%s4375_s27 + $0x30] sm:$0xff]  ;;  %v553_v16 = vld [vmem:[%s4375_s27 + $0x28] sm:$0xff]  ;;  %v3790_v50 = vld [vmem:[%s5221_s3 + $0x38] sm:$0xff]   ;;  %s3597_s0 = smul.u32 56, %s539_s20  ;;  %s3076_s28 = scalar_lea.sflag [#allocation3], %s539_s20 }
  0x36   : > { %1180 = vmatprep.subr.bf16.mxu0 %v3684_v27  ;;  %1220 = vmatpush1.bf16.msra.mxu1 %v3683_v28  ;;  %v659_v17 = vpack.c.bf16 %v553_v16, %v553_v16  ;;  %v3749_v20 = vld [vmem:[%s5255_s23 + $0x244] ss:$8 sps:$4 sm:$0xff]   ;;  %v660_v21 = vpack.c.bf16 %v554_v15, %v554_v15  ;;  %v3747_v22 = vld [vmem:[%s5255_s23 + $0x240] ss:$8 sps:$4 sm:$0xff]   ;;  %v3752_v23 = vld [vmem:[%s5255_s23 + $0x234] ss:$8 sps:$4 sm:$0xff]  }
  0x37   : > { %1221 = vmatprep.subr.bf16.mxu1 %v3687_v29  ;;  %v3750_v24 = vld [vmem:[%s5255_s23 + $0x230] ss:$8 sps:$4 sm:$0xff]   ;;  %v3755_v25 = vld [vmem:[%s5255_s23 + $0x224] ss:$8 sps:$4 sm:$0xff]   ;;  %v3753_v26 = vld [vmem:[%s5255_s23 + $0x220] ss:$8 sps:$4 sm:$0xff]  }
  0x38   : > { %v3758_v27 = vld [vmem:[%s5255_s23 + $0x214] ss:$8 sps:$4 sm:$0xff]   ;;  %v3756_v28 = vld [vmem:[%s5255_s23 + $0x210] ss:$8 sps:$4 sm:$0xff]   ;;  %v3761_v29 = vld [vmem:[%s5255_s23 + $0x204] ss:$8 sps:$4 sm:$0xff]  }
  0x39   : > { %1181 = vmatpush1.bf16.msra.mxu0 %v3686_v30  ;;  %v3759_v30 = vld [vmem:[%s5255_s23 + $0x200] ss:$8 sps:$4 sm:$0xff]   ;;  %v3792_v52 = vld [vmem:[%s5221_s3 + $0x30] sm:$0xff]   ;;  %s541_s24 = scalar_lea.vmem [#allocation2], %s3597_s0  ;;  %s4102_s17 = smov [#allocation2]  }
  0x3a   : > { %1182 = vmatprep.subr.bf16.mxu0 %v3690_v31  ;;  %1222 = vmatpush1.bf16.msra.mxu1 %v3689_v32  ;;  %v3764_v31 = vld [vmem:[%s5255_s23 + $0x2f4] ss:$8 sps:$4 sm:$0xff]   ;;  %v3762_v32 = vld [vmem:[%s5255_s23 + $0x2f0] ss:$8 sps:$4 sm:$0xff]   ;;  %v3786_v46 = vld [vmem:[%s5255_s23 + $0x280] ss:$8 sps:$4 sm:$0xff]  }
  0x3b   : > { %1223 = vmatprep.subr.bf16.mxu1 %v3693_v33  ;;  %v3767_v33 = vld [vmem:[%s5255_s23 + $0x2e4] ss:$8 sps:$4 sm:$0xff]   ;;  %s3090_s22 = sshll.u32 %s541_s24, 4  ;;  %s5178_s22 = int_to_ptr.vmem [resolvable:$true] %s3090_s22 }
  0x3c   : > { %s4037_s26 = scalar_lea.vmem %s5178_s22, 896 }
  0x3d   : > { %1183 = vmatpush2.bf16.msra.mxu0 %v3692_v34  ;;  %v3765_v34 = vld [vmem:[%s5255_s23 + $0x2e0] ss:$8 sps:$4 sm:$0xff]   ;;  %p4038_p11 = scmp.ne.s32.totalorder %s5178_s22, %s4037_s26 }
  0x3e   : > { %1184 = vmatprep.subr.bf16.mxu0 %v3696_v35  ;;  %1224 = vmatpush2.bf16.msra.mxu1 %v3695_v36  ;;  %v3770_v35 = vld [vmem:[%s5255_s23 + $0x2d4] ss:$8 sps:$4 sm:$0xff]   ;;  %v3768_v36 = vld [vmem:[%s5255_s23 + $0x2d0] ss:$8 sps:$4 sm:$0xff]  }
  0x3f   : > { %1225 = vmatprep.subr.bf16.mxu1 %v3699_v37  ;;  %v3773_v37 = vld [vmem:[%s5255_s23 + $0x2c4] ss:$8 sps:$4 sm:$0xff]   ;;  %p4039_p12 = pnand %p4038_p11, %p4231_p5 }
  0x41   : > { %1185 = vmatpush2.bf16.msra.mxu0 %v3698_v38  ;;  %v3771_v38 = vld [vmem:[%s5255_s23 + $0x2c0] ss:$8 sps:$4 sm:$0xff]   ;;  %p4040_p13 = pneg %p4039_p12 }
  0x42   : > { %1186 = vmatprep.subr.bf16.mxu0 %v3702_v39  ;;  %1226 = vmatpush2.bf16.msra.mxu1 %v3701_v40  ;;  %v3776_v39 = vld [vmem:[%s5255_s23 + $0x2b4] ss:$8 sps:$4 sm:$0xff]   ;;  %v3774_v40 = vld [vmem:[%s5255_s23 + $0x2b0] ss:$8 sps:$4 sm:$0xff]  }
  0x43   : > { %1227 = vmatprep.subr.bf16.mxu1 %v3705_v41  ;;  %v3779_v41 = vld [vmem:[%s5255_s23 + $0x2a4] ss:$8 sps:$4 sm:$0xff]  }
  0x45   : > { %1187 = vmatpush2.bf16.msra.mxu0 %v3704_v42  ;;  %v3777_v42 = vld [vmem:[%s5255_s23 + $0x2a0] ss:$8 sps:$4 sm:$0xff]  }
  0x46   : > { %1188 = vmatprep.subr.bf16.mxu0 %v3708_v43  ;;  %1228 = vmatpush2.bf16.msra.mxu1 %v3707_v44  ;;  %v3782_v43 = vld [vmem:[%s5255_s23 + $0x294] ss:$8 sps:$4 sm:$0xff]   ;;  %v3780_v44 = vld [vmem:[%s5255_s23 + $0x290] ss:$8 sps:$4 sm:$0xff]  }
  0x47   : > { %1229 = vmatprep.subr.bf16.mxu1 %v3711_v45  ;;  %v3788_v45 = vld [vmem:[%s5255_s23 + $0x284] ss:$8 sps:$4 sm:$0xff]  }
  0x49   : > { %1189 = vmatpush2.bf16.msra.mxu0 %v3710_v47  ;;  %v552_v47 = vld [vmem:[%s4375_s27 + $0x20] sm:$0xff]  ;;  %s4041_s27 = sshll.u32 %s4102_s17, 4  ;;  %s4042_s27 = int_to_ptr.vmem [resolvable:$false] %s4041_s27 }
  0x4a   : > { %1190 = vmatprep.subr.bf16.mxu0 %v3714_v49  ;;  %1230 = vmatpush2.bf16.msra.mxu1 %v3713_v51  ;;  %v658_v48 = vpack.c.bf16 %v552_v47, %v552_v47  ;;  %v3789_v49 = vld [vmem:[%s5221_s3 + $0x78] sm:$0xff]   ;;  %v3791_v51 = vld [vmem:[%s5221_s3 + $0x70] sm:$0xff]   ;;  %s4043_s0 = scalar_lea.vmem %s4042_s27, 1792  ;;  %p4044_p0 = scmp.lt.s32.totalorder %s5178_s22, %s4042_s27 }
  0x4b   : > { %1231 = vmatprep.subr.bf16.mxu1 %v3717_v53  ;;  %v3793_v53 = vld [vmem:[%s5221_s3 + $0x68] sm:$0xff]   ;;  %v3814_v47 = vld [vmem:[%s5225_s7 + $0x30] sm:$0xff]   ;;  %p4045_p1 = scmp.lt.s32.totalorder %s4043_s0, %s4037_s26 }
  0x4d   : > { %1191 = vmatpush2.bf16.msra.mxu0 %v3716_v54  ;;  %v3794_v54 = vld [vmem:[%s5221_s3 + $0x28] sm:$0xff]   ;;  %p4046_p2 = por %p4045_p1, %p4044_p0 }
  0x4e   : > { %1192 = vmatprep.subr.bf16.mxu0 %v3720_v55  ;;  %1232 = vmatpush2.bf16.msra.mxu1 %v3719_v56  ;;  %v3795_v55 = vld [vmem:[%s5221_s3 + $0x60] sm:$0xff]  }
  0x4f   : > { %1233 = vmatprep.subr.bf16.mxu1 %v3723_v57  ;;  %v3796_v56 = vld [vmem:[%s5221_s3 + $0x20] sm:$0xff]   ;;  %v3797_v57 = vld [vmem:[%s5221_s3 + $0x58] sm:$0xff]   ;;  %p4047_p3 = pnand %p4046_p2, %p4040_p13 }
  0x51   : > { %1193 = vmatpush2.bf16.msra.mxu0 %v3722_v58  ;;  %v3798_v58 = vld [vmem:[%s5221_s3 + $0x18] sm:$0xff]  }
  0x52   : > { %1194 = vmatprep.subr.bf16.mxu0 %v3726_v59  ;;  %1234 = vmatpush2.bf16.msra.mxu1 %v3725_v60  ;;  %v3799_v59 = vld [vmem:[%s5221_s3 + $0x50] sm:$0xff]  }
  0x53   : > { %1235 = vmatprep.subr.bf16.mxu1 %v3729_v61  ;;  %v3800_v60 = vld [vmem:[%s5221_s3 + $0x10] sm:$0xff]   ;;  %v3801_v61 = vld [vmem:[%s5221_s3 + $0x48] sm:$0xff]  }
  0x55   : > { %1195 = vmatpush2.bf16.msra.mxu0 %v3728_v62  ;;  %v3802_v62 = vld [vmem:[%s5221_s3 + $0x8] sm:$0xff]  }
  0x56   : > { %1196 = vmatprep.subr.bf16.mxu0 %v3732_v63  ;;  %1236 = vmatpush2.bf16.msra.mxu1 %v3731_v0  ;;  %v3803_v63 = vld [vmem:[%s5221_s3 + $0x40] sm:$0xff]  }
  0x57   : > { %1237 = vmatprep.subr.bf16.mxu1 %v3735_v2  ;;  %v3804_v0 = vld [vmem:[%s5221_s3] sm:$0xff]  }
  0x59   : > { %1197 = vmatpush2.bf16.msra.mxu0 %v3734_v1  ;;  %v4100_v1 = vmov 0.0  }
  0x5a   : > { %1248 = vmatprep.subr.bf16.mxu0 %v3740_v5  ;;  %1238 = vmatpush2.bf16.msra.mxu1 %v3737_v3 }
  0x5b   : > { %1303 = vmatprep.subr.bf16.mxu1 %v3785_v12 }
  0x5c   : > { %1199 = vmatmul.mubr.bf16.vlgmr.msra.gmra.mxu0 %v654_v7 }
  0x5d   : > { %1249 = vmatpush1.bf16.msra.mxu0 %v3738_v8  ;;  %1240 = vmatmul.mubr.bf16.vlgmr.msra.gmra.mxu1 %v656_v10 }
  0x5e   : > { %1250 = vmatprep.subr.bf16.mxu0 %v3743_v9  ;;  %1304 = vmatpush1.bf16.msra.mxu1 %v3783_v11 }
  0x5f   : > { %1321 = vmatprep.mubr.bf16.mxu1 %v4099_v19  ;;  %1280 = vmatprep.mubr.bf16.mxu0 %v659_v17  ;;  %v653_v17 = vld [vmem:[%s5220_s2] sm:$0x3] }
  0x60   : > { %3437 = vmatprep.subr.bf16.mxu1 %v3789_v49  ;;  %v3816_v49 = vld [vmem:[%s5225_s7 + $0x20] sm:$0xff]  }
  0x61   : > { %1251 = vmatpush1.bf16.msra.mxu0 %v3741_v13 }
  0x62   : > { %1252 = vmatprep.subr.bf16.mxu0 %v3746_v14  ;;  %v662_v14 = vlaneseq }
  0x64   : > { %v4601_v15 = vshrl.u32 %v662_v14, 7  ;;  %v3827_v14 = vld [vmem:[%s5227_s9 + $0x8] sm:$0xff]  }
  0x65   : > { %1253 = vmatpush1.bf16.msra.mxu0 %v3744_v18  ;;  %3252 = vmatmul.mubr.msk.bf16.vlgmr.msra.gmra.mxu1 %vm1162_vm0, %v660_v21 }
  0x66   : > { %1254 = vmatprep.subr.bf16.mxu0 %v3749_v20  ;;  %3438 = vmatpush3.bf16.msra.mxu1 %v3790_v50  ;;  %v4604_v16 = vsub.s32 0, %v4601_v15  ;;  %v4610_v18 = vsub.s32 1, %v4601_v15  ;;  %v3817_v50 = vld [vmem:[%s5225_s7 + $0x18] sm:$0xff]  }
  0x67   : > { %3439 = vmatprep.subr.bf16.mxu1 %v3791_v51  ;;  %v3818_v51 = vld [vmem:[%s5225_s7 + $0x10] sm:$0xff]  }
  0x68   : > { %v665_v20 = vrot.slane %v653_v17, %v4604_v16  ;;  %v669_v21 = vrot.slane %v653_v17, %v4610_v18  ;;  %v3828_v17 = vld [vmem:[%s5227_s9] sm:$0xff]  }
  0x69   : > { %1255 = vmatpush1.bf16.msra.mxu0 %v3747_v22 }
  0x6a   : > { %1256 = vmatprep.subr.bf16.mxu0 %v3752_v23  ;;  %3440 = vmatpush3.bf16.msra.mxu1 %v3792_v52 }
  0x6b   : > { %3441 = vmatprep.subr.bf16.mxu1 %v3793_v53  ;;  %v3253_v53 = vld [vmem:[%s5222_s4] ss:$0 sm:$0xff] }
  0x6d   : > { %1257 = vmatpush1.bf16.msra.mxu0 %v3750_v24 }
  0x6e   : > { %1258 = vmatprep.subr.bf16.mxu0 %v3755_v25  ;;  %3442 = vmatpush3.bf16.msra.mxu1 %v3794_v54 }
  0x6f   : > { %3443 = vmatprep.subr.bf16.mxu1 %v3795_v55 }
  0x71   : > { %1259 = vmatpush1.bf16.msra.mxu0 %v3753_v26 }
  0x72   : > { %1260 = vmatprep.subr.bf16.mxu0 %v3758_v27  ;;  %3444 = vmatpush3.bf16.msra.mxu1 %v3796_v56 }
  0x73   : > { %3445 = vmatprep.subr.bf16.mxu1 %v3797_v57 }
  0x75   : > { %1261 = vmatpush1.bf16.msra.mxu0 %v3756_v28 }
  0x76   : > { %1262 = vmatprep.subr.bf16.mxu0 %v3761_v29  ;;  %3446 = vmatpush3.bf16.msra.mxu1 %v3798_v58 }
  0x77   : > { %3447 = vmatprep.subr.bf16.mxu1 %v3799_v59 }
  0x79   : > { %1263 = vmatpush1.bf16.msra.mxu0 %v3759_v30 }
  0x7a   : > { %1264 = vmatprep.subr.bf16.mxu0 %v3764_v31  ;;  %3448 = vmatpush3.bf16.msra.mxu1 %v3800_v60 }
  0x7b   : > { %3449 = vmatprep.subr.bf16.mxu1 %v3801_v61  ;;  %v3819_v61 = vld [vmem:[%s5225_s7 + $0x8] sm:$0xff]  }
  0x7d   : > { %1265 = vmatpush2.bf16.msra.mxu0 %v3762_v32 }
  0x7e   : > { %1266 = vmatprep.subr.bf16.mxu0 %v3767_v33  ;;  %3450 = vmatpush3.bf16.msra.mxu1 %v3802_v62  ;;  %v3820_v62 = vld [vmem:[%s5225_s7] sm:$0xff]  }
  0x7f   : > { %3451 = vmatprep.subr.bf16.mxu1 %v3803_v63  ;;  %v3821_v63 = vld [vmem:[%s5227_s9 + $0x38] sm:$0xff]  }
  0x81   : > { %1267 = vmatpush2.bf16.msra.mxu0 %v3765_v34 }
  0x82   : > { %1268 = vmatprep.subr.bf16.mxu0 %v3770_v35  ;;  %3452 = vmatpush3.bf16.msra.mxu1 %v3804_v0  ;;  %v3822_v0 = vld [vmem:[%s5227_s9 + $0x30] sm:$0xff]  }
  0x83   : > { %3517 = vmatprep.subr.bf16.mxu1 %v4100_v1 }
  0x85   : > { %1269 = vmatpush2.bf16.msra.mxu0 %v3768_v36 }
  0x86   : > { %1270 = vmatprep.subr.bf16.mxu0 %v3773_v37  ;;  %v3805_v37 = vld [vmem:[%s5223_s5 + $0x38] sm:$0xff]  }
  0x89   : > { %1271 = vmatpush2.bf16.msra.mxu0 %v3771_v38 }
  0x8a   : > { %1272 = vmatprep.subr.bf16.mxu0 %v3776_v39  ;;  %v3806_v39 = vld [vmem:[%s5223_s5 + $0x30] sm:$0xff]  }
  0x8d   : > { %1273 = vmatpush2.bf16.msra.mxu0 %v3774_v40  ;;  %v3807_v40 = vld [vmem:[%s5223_s5 + $0x28] sm:$0xff]  }
  0x8e   : > { %1274 = vmatprep.subr.bf16.mxu0 %v3779_v41  ;;  %v3808_v41 = vld [vmem:[%s5223_s5 + $0x20] sm:$0xff]  }
  0x91   : > { %1275 = vmatpush2.bf16.msra.mxu0 %v3777_v42  ;;  %v3809_v42 = vld [vmem:[%s5223_s5 + $0x18] sm:$0xff]  }
  0x92   : > { %1276 = vmatprep.subr.bf16.mxu0 %v3782_v43  ;;  %v3810_v43 = vld [vmem:[%s5223_s5 + $0x10] sm:$0xff]  }
  0x95   : > { %1277 = vmatpush2.bf16.msra.mxu0 %v3780_v44  ;;  %v3811_v44 = vld [vmem:[%s5223_s5 + $0x8] sm:$0xff]  }
  0x96   : > { %1278 = vmatprep.subr.bf16.mxu0 %v3788_v45  ;;  %v3812_v45 = vld [vmem:[%s5223_s5] sm:$0xff]  }
  0x99   : > { %1279 = vmatpush2.bf16.msra.mxu0 %v3786_v46  ;;  %v3813_v46 = vld [vmem:[%s5225_s7 + $0x38] sm:$0xff]  }
  0x9a   : > { %3537 = vmatprep.subr.bf16.mxu0 %v4100_v1 }
  0x9c   : > { %1281 = vmatmul.mubr.bf16.vlgmr.msra.gmra.mxu0 %v658_v48  ;;  %v3815_v48 = vld [vmem:[%s5225_s7 + $0x28] sm:$0xff]  }
  0x9d   : > { %3553 = vmatprep.mubr.msk.bf16.mxu0 %vm4101_vm1, %v4100_v1  ;;  %3538 = vmatpush3.bf16.msra.mxu0 %v3813_v46  ;;  %v3857_v46 = vld [vmem:[%s5231_s13 + $0x14] ss:$8 sps:$4 sm:$0xff]  }
  0x9e   : > { %3539 = vmatprep.subr.bf16.mxu0 %v4100_v1 }
  0xa1   : > { %3540 = vmatpush3.bf16.msra.mxu0 %v3814_v47  ;;  %v3855_v47 = vld [vmem:[%s5231_s13 + $0x10] ss:$8 sps:$4 sm:$0xff]  }
  0xa2   : > { %3541 = vmatprep.subr.bf16.mxu0 %v4100_v1 }
  0xa5   : > { %3542 = vmatpush3.bf16.msra.mxu0 %v3815_v48  ;;  %v3288_v48 = vld [vmem:[%s5228_s10] ss:$0 sm:$0xff] }
  0xa6   : > { %3543 = vmatprep.subr.bf16.mxu0 %v4100_v1 }
  0xa9   : > { %3544 = vmatpush3.bf16.msra.mxu0 %v3816_v49 }
  0xaa   : > { %3545 = vmatprep.subr.bf16.mxu0 %v4100_v1 }
  0xad   : > { %3546 = vmatpush3.bf16.msra.mxu0 %v3817_v50 }
  0xae   : > { %3547 = vmatprep.subr.bf16.mxu0 %v4100_v1 }
  0xb1   : > { %3548 = vmatpush3.bf16.msra.mxu0 %v3818_v51 }
  0xb2   : > { %3549 = vmatprep.subr.bf16.mxu0 %v4100_v1 }
  0xb5   : > { %3550 = vmatpush3.bf16.msra.mxu0 %v3819_v61  ;;  %v3869_v61 = vld [vmem:[%s5233_s15 + $0x154] ss:$28 sps:$4 sm:$0xff]  }
  0xb6   : > { %3551 = vmatprep.subr.bf16.mxu0 %v4100_v1 }
  0xb9   : > { %3552 = vmatpush3.bf16.msra.mxu0 %v3820_v62  ;;  %v3867_v62 = vld [vmem:[%s5233_s15 + $0x150] ss:$28 sps:$4 sm:$0xff]  }
  0xba   : > { %3577 = vmatprep.subr.bf16.mxu0 %v4100_v1 }
 0x11c   : > { %v1200_v2 = vpop.f32.mrf.mxu0 }
 0x11d   : > { %v1241_v4 = vpop.f32.mrf.mxu1  ;;  %v1201_v22 = vadd.f32 %v1200_v2, %v665_v20  ;;  %v3823_v2 = vld [vmem:[%s5227_s9 + $0x28] sm:$0xff]   ;;  %v3829_v20 = vld [vmem:[%s5229_s11 + $0x38] sm:$0xff]  }
 0x11e   : > { %v1202_v3 = vpop.f32.mrf.mxu0 }
 0x11f   : > { %v1243_v6 = vpop.f32.mrf.mxu1  ;;  %v1203_v23 = vadd.f32 %v1202_v3, %v669_v21  ;;  %v1242_v24 = vadd.f32 %v1241_v4, %v1201_v22  ;;  %v3824_v3 = vld [vmem:[%s5227_s9 + $0x20] sm:$0xff]   ;;  %v3825_v4 = vld [vmem:[%s5227_s9 + $0x18] sm:$0xff]   ;;  %v3830_v21 = vld [vmem:[%s5229_s11 + $0x30] sm:$0xff]  }
 0x120   : > { %v1204_v5 = vpop.f32.mrf.mxu0  ;;  %v3831_v22 = vld [vmem:[%s5229_s11 + $0x28] sm:$0xff]  }
 0x121   : > { %v1245_v8 = vpop.f32.mrf.mxu1  ;;  %v1244_v26 = vadd.f32 %v1243_v6, %v1203_v23  ;;  %v3826_v5 = vld [vmem:[%s5227_s9 + $0x10] sm:$0xff]   ;;  %v3270_v6 = vld [vmem:[%s5224_s6] ss:$0 sm:$0xff] }
 0x122   : > { %v1205_v7 = vpop.f32.mrf.mxu0  ;;  %v3832_v23 = vld [vmem:[%s5229_s11 + $0x20] sm:$0xff]  }
 0x123   : > { %v1246_v9 = vpop.f32.mrf.mxu1 }
 0x125   : > { %v1323_v10 = vpop.f32.mrf.mxu1 }
 0x127   : > { %v1325_v11 = vpop.f32.mrf.mxu1 }
 0x129   : > { %v1327_v12 = vpop.f32.mrf.mxu1 }
 0x12b   : > { %v1328_v13 = vpop.f32.mrf.mxu1 }
 0x15c   : > { %v1282_v25 = vpop.f32.mrf.mxu0 }
 0x15d   : > { %v1283_v27 = vadd.f32 %v1282_v25, %v1242_v24  ;;  %v3833_v24 = vld [vmem:[%s5229_s11 + $0x18] sm:$0xff]   ;;  %v3834_v25 = vld [vmem:[%s5229_s11 + $0x10] sm:$0xff]  }
 0x15e   : > { %v1284_v28 = vpop.f32.mrf.mxu0 }
 0x15f   : > { %v1324_v29 = vadd.f32 %v1323_v10, %v1283_v27  ;;  %v1285_v30 = vadd.f32 %v1284_v28, %v1244_v26  ;;  %v3279_v26 = vld [vmem:[%s5226_s8] ss:$0 sm:$0xff] }
 0x160   : > { %v1286_v31 = vpop.f32.mrf.mxu0 }
 0x161   : > { %v1326_v32 = vadd.f32 %v1325_v11, %v1285_v30  ;;  %v1330_v33 = vmax.f32 %v1324_v29, 0.0 }
 0x162   : > { %v1287_v34 = vpop.f32.mrf.mxu0 }
 0x163   : > { %v1331_v35 = vmax.f32 %v1326_v32, 0.0  ;;  %v1365_v38 = vpack.c.bf16 %v1330_v33, %v1330_v33  ;;  %v3835_v34 = vld [vmem:[%s5229_s11 + $0x8] sm:$0xff]  }
 0x165   : > { %v1366_v36 = vpack.c.bf16 %v1331_v35, %v1331_v35  ;;  %v3836_v35 = vld [vmem:[%s5229_s11] sm:$0xff]  }
 0x167   : > { %1501 = vmatprep.mubr.bf16.mxu1 %v1366_v36  ;;  %v3837_v36 = vld [vmem:[%s5231_s13 + $0x70] ss:$8 sps:$4 sm:$0xff]  }
 0x168   : > { %1502 = vmatmul.mubr.bf16.vlgmr.msra.gmra.mxu1 %v1365_v38  ;;  %v3845_v38 = vld [vmem:[%s5231_s13 + $0x54] ss:$8 sps:$4 sm:$0xff]  }
 0x169   : > { %3518 = vmatpush3.bf16.msra.mxu1 %v3805_v37  ;;  %3533 = vmatprep.mubr.msk.bf16.mxu1 %vm4101_vm1, %v4100_v1  ;;  %v3842_v37 = vld [vmem:[%s5231_s13 + $0x64] ss:$8 sps:$4 sm:$0xff]  }
 0x16a   : > { %3519 = vmatprep.subr.bf16.mxu1 %v4100_v1 }
 0x16d   : > { %3520 = vmatpush3.bf16.msra.mxu1 %v3806_v39  ;;  %v3843_v39 = vld [vmem:[%s5231_s13 + $0x50] ss:$8 sps:$4 sm:$0xff]  }
 0x16e   : > { %3521 = vmatprep.subr.bf16.mxu1 %v4100_v1 }
 0x171   : > { %3522 = vmatpush3.bf16.msra.mxu1 %v3807_v40  ;;  %v3848_v40 = vld [vmem:[%s5231_s13 + $0x44] ss:$8 sps:$4 sm:$0xff]  }
 0x172   : > { %3523 = vmatprep.subr.bf16.mxu1 %v4100_v1 }
 0x175   : > { %3524 = vmatpush3.bf16.msra.mxu1 %v3808_v41  ;;  %v3846_v41 = vld [vmem:[%s5231_s13 + $0x40] ss:$8 sps:$4 sm:$0xff]  }
 0x176   : > { %3525 = vmatprep.subr.bf16.mxu1 %v4100_v1 }
 0x179   : > { %3526 = vmatpush3.bf16.msra.mxu1 %v3809_v42  ;;  %v3851_v42 = vld [vmem:[%s5231_s13 + $0x34] ss:$8 sps:$4 sm:$0xff]  }
 0x17a   : > { %3527 = vmatprep.subr.bf16.mxu1 %v4100_v1 }
 0x17d   : > { %3528 = vmatpush3.bf16.msra.mxu1 %v3810_v43  ;;  %v3849_v43 = vld [vmem:[%s5231_s13 + $0x30] ss:$8 sps:$4 sm:$0xff]  }
 0x17e   : > { %3529 = vmatprep.subr.bf16.mxu1 %v4100_v1 }
 0x181   : > { %3530 = vmatpush3.bf16.msra.mxu1 %v3811_v44  ;;  %v3854_v44 = vld [vmem:[%s5231_s13 + $0x24] ss:$8 sps:$4 sm:$0xff]  }
 0x182   : > { %3531 = vmatprep.subr.bf16.mxu1 %v4100_v1 }
 0x185   : > { %3532 = vmatpush3.bf16.msra.mxu1 %v3812_v45  ;;  %v3852_v45 = vld [vmem:[%s5231_s13 + $0x20] ss:$8 sps:$4 sm:$0xff]  }
 0x186   : > { %3557 = vmatprep.subr.bf16.mxu1 %v4100_v1 }
 0x228   : > { %v3453_v52 = vpop.f32.mrf.mxu1 }
 0x22a   : > { %v3454_v54 = vpop.f32.mrf.mxu1 }
 0x22b   : > { %v3455_v55 = vadd.f32 %v3454_v54, %v3453_v52 }
 0x22c   : > { %v3456_v56 = vpop.f32.mrf.mxu1 }
 0x22d   : > { %v1504_v57 = vadd.f32 %v3455_v55, %v3253_v53  ;;  %v3860_v56 = vld [vmem:[%s5231_s13 + $0x4] ss:$8 sps:$4 sm:$0xff]  }
 0x22e   : > { %v3457_v58 = vpop.f32.mrf.mxu1 }
 0x22f   : > { %v1509_v59 = vmax.f32 %v1504_v57, 0.0  ;;  %v3858_v57 = vld [vmem:[%s5231_s13] ss:$8 sps:$4 sm:$0xff]  }
 0x230   : > { %v3861_v58 = vld [vmem:[%s5233_s15 + $0x188] ss:$28 sps:$4 sm:$0xff]  }
 0x231   : > { %v1527_v60 = vpack.c.bf16 %v1509_v59, %v1509_v59  ;;  %v3863_v59 = vld [vmem:[%s5233_s15 + $0x18c] ss:$28 sps:$4 sm:$0xff]  }
 0x233   : > { %3534 = vmatmul.mubr.bf16.vlgmr.msra.gmra.mxu1 %v1527_v60  ;;  %v3866_v60 = vld [vmem:[%s5233_s15 + $0x194] ss:$28 sps:$4 sm:$0xff]  }
 0x234   : > { %3573 = vmatprep.mubr.msk.bf16.mxu1 %vm4101_vm1, %v4100_v1  ;;  %3558 = vmatpush3.bf16.msra.mxu1 %v3821_v63  ;;  %v3875_v63 = vld [vmem:[%s5233_s15 + $0x11c] ss:$28 sps:$4 sm:$0xff]  }
 0x235   : > { %3559 = vmatprep.subr.bf16.mxu1 %v4100_v1 }
 0x238   : > { %3560 = vmatpush3.bf16.msra.mxu1 %v3822_v0  ;;  %v3873_v0 = vld [vmem:[%s5233_s15 + $0x118] ss:$28 sps:$4 sm:$0xff]  }
 0x239   : > { %3561 = vmatprep.subr.bf16.mxu1 %v4100_v1 }
 0x23c   : > { %3562 = vmatpush3.bf16.msra.mxu1 %v3823_v2  ;;  %v3881_v2 = vld [vmem:[%s5233_s15 + $0xe4] ss:$28 sps:$4 sm:$0xff]  }
 0x23d   : > { %3563 = vmatprep.subr.bf16.mxu1 %v4100_v1 }
 0x240   : > { %3564 = vmatpush3.bf16.msra.mxu1 %v3824_v3  ;;  %v3879_v3 = vld [vmem:[%s5233_s15 + $0xe0] ss:$28 sps:$4 sm:$0xff]  }
 0x241   : > { %3565 = vmatprep.subr.bf16.mxu1 %v4100_v1 }
 0x244   : > { %3566 = vmatpush3.bf16.msra.mxu1 %v3825_v4  ;;  %v3887_v4 = vld [vmem:[%s5233_s15 + $0xac] ss:$28 sps:$4 sm:$0xff]  }
 0x245   : > { %3567 = vmatprep.subr.bf16.mxu1 %v4100_v1 }
 0x248   : > { %3568 = vmatpush3.bf16.msra.mxu1 %v3826_v5  ;;  %v3885_v5 = vld [vmem:[%s5233_s15 + $0xa8] ss:$28 sps:$4 sm:$0xff]  }
 0x249   : > { %3569 = vmatprep.subr.bf16.mxu1 %v4100_v1 }
 0x24c   : > { %3570 = vmatpush3.bf16.msra.mxu1 %v3827_v14  ;;  %v3917_v14 = vld [vmem:[%s5233_s15 + $0x314] ss:$28 sps:$4 sm:$0xff]  }
 0x24d   : > { %3571 = vmatprep.subr.bf16.mxu1 %v4100_v1 }
 0x250   : > { %3572 = vmatpush3.bf16.msra.mxu1 %v3828_v17  ;;  %v3915_v17 = vld [vmem:[%s5233_s15 + $0x310] ss:$28 sps:$4 sm:$0xff]  }
 0x2f3   : > { %v1616_v7 = vpop.f32.mrf.mxu1 }
 0x2f4   : > { %v1617_v8 = vadd.f32 %v3270_v6, %v1616_v7  ;;  %v3893_v6 = vld [vmem:[%s5233_s15 + $0x74] ss:$28 sps:$4 sm:$0xff]  }
 0x2f5   : > { %v3535_v9 = vpop.f32.mrf.mxu1  ;;  %v3891_v7 = vld [vmem:[%s5233_s15 + $0x70] ss:$28 sps:$4 sm:$0xff]  }
 0x2f6   : > { %v1622_v10 = vmax.f32 %v1617_v8, 0.0  ;;  %v3899_v8 = vld [vmem:[%s5233_s15 + $0x3c] ss:$28 sps:$4 sm:$0xff]  }
 0x2f7   : > { %v1619_v11 = vpop.f32.mrf.mxu1  ;;  %v3897_v9 = vld [vmem:[%s5233_s15 + $0x38] ss:$28 sps:$4 sm:$0xff]  }
 0x2f8   : > { %v1640_v12 = vpack.c.bf16 %v1622_v10, %v1622_v10  ;;  %v3905_v10 = vld [vmem:[%s5233_s15 + $0x4] ss:$28 sps:$4 sm:$0xff]  }
 0x2f9   : > { %v3536_v13 = vpop.f32.mrf.mxu1  ;;  %v3903_v11 = vld [vmem:[%s5233_s15] ss:$28 sps:$4 sm:$0xff]  }
 0x2fa   : > { %3554 = vmatmul.mubr.bf16.vlgmr.msra.gmra.mxu0 %v1640_v12  ;;  %v3911_v12 = vld [vmem:[%s5233_s15 + $0x34c] ss:$28 sps:$4 sm:$0xff]  }
 0x2fb   : > { %3593 = vmatprep.mubr.msk.bf16.mxu0 %vm4101_vm1, %v4100_v1  ;;  %3578 = vmatpush3.bf16.msra.mxu0 %v3829_v20  ;;  %v3909_v13 = vld [vmem:[%s5233_s15 + $0x348] ss:$28 sps:$4 sm:$0xff]   ;;  %v3923_v20 = vld [vmem:[%s5233_s15 + $0x2dc] ss:$28 sps:$4 sm:$0xff]  }
 0x2fc   : > { %3579 = vmatprep.subr.bf16.mxu0 %v4100_v1 }
 0x2ff   : > { %3580 = vmatpush3.bf16.msra.mxu0 %v3830_v21  ;;  %v3921_v21 = vld [vmem:[%s5233_s15 + $0x2d8] ss:$28 sps:$4 sm:$0xff]  }
 0x300   : > { %3581 = vmatprep.subr.bf16.mxu0 %v4100_v1 }
 0x303   : > { %3582 = vmatpush3.bf16.msra.mxu0 %v3831_v22  ;;  %v3929_v22 = vld [vmem:[%s5233_s15 + $0x2a4] ss:$28 sps:$4 sm:$0xff]  }
 0x304   : > { %3583 = vmatprep.subr.bf16.mxu0 %v4100_v1 }
 0x307   : > { %3584 = vmatpush3.bf16.msra.mxu0 %v3832_v23  ;;  %v3927_v23 = vld [vmem:[%s5233_s15 + $0x2a0] ss:$28 sps:$4 sm:$0xff]  }
 0x308   : > { %3585 = vmatprep.subr.bf16.mxu0 %v4100_v1 }
 0x30b   : > { %3586 = vmatpush3.bf16.msra.mxu0 %v3833_v24  ;;  %v3935_v24 = vld [vmem:[%s5233_s15 + $0x26c] ss:$28 sps:$4 sm:$0xff]  }
 0x30c   : > { %3587 = vmatprep.subr.bf16.mxu0 %v4100_v1 }
 0x30f   : > { %3588 = vmatpush3.bf16.msra.mxu0 %v3834_v25  ;;  %v3933_v25 = vld [vmem:[%s5233_s15 + $0x268] ss:$28 sps:$4 sm:$0xff]  }
 0x310   : > { %3589 = vmatprep.subr.bf16.mxu0 %v4100_v1 }
 0x313   : > { %3590 = vmatpush3.bf16.msra.mxu0 %v3835_v34  ;;  %v3864_v34 = vld [vmem:[%s5233_s15 + $0x190] ss:$28 sps:$4 sm:$0xff]  }
 0x314   : > { %3591 = vmatprep.subr.bf16.mxu0 %v4100_v1  ;;  %v3840_v1 = vld [vmem:[%s5231_s13 + $0x60] ss:$8 sps:$4 sm:$0xff]  }
 0x317   : > { %3592 = vmatpush3.bf16.msra.mxu0 %v3836_v35 }
 0x318   : > { %2857 = vmatprep.subr.bf16.mxu0 %v3863_v59  ;;  %v3944_v59 = vld [vmem:[%s5233_s15 + $0x23c] ss:$28 sps:$4 sm:$0xff]  }
 0x3ba   : > { %v1729_v27 = vpop.f32.mrf.mxu0 }
 0x3bb   : > { %v1730_v28 = vadd.f32 %v3279_v26, %v1729_v27  ;;  %v3941_v26 = vld [vmem:[%s5233_s15 + $0x234] ss:$28 sps:$4 sm:$0xff]  }
 0x3bc   : > { %v3555_v29 = vpop.f32.mrf.mxu0  ;;  %v3939_v27 = vld [vmem:[%s5233_s15 + $0x230] ss:$28 sps:$4 sm:$0xff]  }
 0x3bd   : > { %v1735_v30 = vmax.f32 %v1730_v28, 0.0  ;;  %v3297_v28 = vld [vmem:[%s5230_s12] ss:$0 sm:$0xff] }
 0x3be   : > { %v1732_v31 = vpop.f32.mrf.mxu0 }
 0x3bf   : > { %v1753_v32 = vpack.c.bf16 %v1735_v30, %v1735_v30 }
 0x3c0   : > { %v3556_v33 = vpop.f32.mrf.mxu0 }
 0x3c1   : > { %3574 = vmatmul.mubr.bf16.vlgmr.msra.gmra.mxu1 %v1753_v32 }
 0x3c2   : > { %2103 = vmatprep.mubr.bf16.mxu1 %v4099_v19  ;;  %v3839_v19 = vld [vmem:[%s5231_s13 + $0x74] ss:$8 sps:$4 sm:$0xff]  }
 0x3c3   : > { %2071 = vmatprep.subr.bf16.mxu1 %v3839_v19 }
 0x3c4   : > { %2072 = vmatpush1.bf16.msra.mxu1 %v3837_v36  ;;  %v3872_v36 = vld [vmem:[%s5233_s15 + $0x15c] ss:$28 sps:$4 sm:$0xff]  }
 0x3c5   : > { %2073 = vmatprep.subr.bf16.mxu1 %v3842_v37  ;;  %v3870_v37 = vld [vmem:[%s5233_s15 + $0x158] ss:$28 sps:$4 sm:$0xff]  }
 0x3c8   : > { %2074 = vmatpush1.bf16.msra.mxu1 %v3840_v1  ;;  %v3878_v1 = vld [vmem:[%s5233_s15 + $0x124] ss:$28 sps:$4 sm:$0xff]  }
 0x3c9   : > { %2075 = vmatprep.subr.bf16.mxu1 %v3845_v38  ;;  %v3876_v38 = vld [vmem:[%s5233_s15 + $0x120] ss:$28 sps:$4 sm:$0xff]  }
 0x3cc   : > { %2076 = vmatpush1.bf16.msra.mxu1 %v3843_v39  ;;  %v3884_v39 = vld [vmem:[%s5233_s15 + $0xec] ss:$28 sps:$4 sm:$0xff]  }
 0x3cd   : > { %2077 = vmatprep.subr.bf16.mxu1 %v3848_v40  ;;  %v3882_v40 = vld [vmem:[%s5233_s15 + $0xe8] ss:$28 sps:$4 sm:$0xff]  }
 0x3d0   : > { %2078 = vmatpush1.bf16.msra.mxu1 %v3846_v41  ;;  %v3890_v41 = vld [vmem:[%s5233_s15 + $0xb4] ss:$28 sps:$4 sm:$0xff]  }
 0x3d1   : > { %2079 = vmatprep.subr.bf16.mxu1 %v3851_v42  ;;  %v3888_v42 = vld [vmem:[%s5233_s15 + $0xb0] ss:$28 sps:$4 sm:$0xff]  }
 0x3d4   : > { %2080 = vmatpush1.bf16.msra.mxu1 %v3849_v43  ;;  %v3896_v43 = vld [vmem:[%s5233_s15 + $0x7c] ss:$28 sps:$4 sm:$0xff]  }
 0x3d5   : > { %2081 = vmatprep.subr.bf16.mxu1 %v3854_v44  ;;  %v3894_v44 = vld [vmem:[%s5233_s15 + $0x78] ss:$28 sps:$4 sm:$0xff]  }
 0x3d8   : > { %2082 = vmatpush1.bf16.msra.mxu1 %v3852_v45  ;;  %v3902_v45 = vld [vmem:[%s5233_s15 + $0x44] ss:$28 sps:$4 sm:$0xff]  }
 0x3d9   : > { %2083 = vmatprep.subr.bf16.mxu1 %v3857_v46  ;;  %v3900_v46 = vld [vmem:[%s5233_s15 + $0x40] ss:$28 sps:$4 sm:$0xff]  }
 0x3dc   : > { %2084 = vmatpush1.bf16.msra.mxu1 %v3855_v47  ;;  %v3908_v47 = vld [vmem:[%s5233_s15 + $0xc] ss:$28 sps:$4 sm:$0xff]  }
 0x3dd   : > { %2085 = vmatprep.subr.bf16.mxu1 %v3860_v56  ;;  %v3930_v56 = vld [vmem:[%s5233_s15 + $0x2a8] ss:$28 sps:$4 sm:$0xff]  }
 0x3e0   : > { %2086 = vmatpush1.bf16.msra.mxu1 %v3858_v57  ;;  %v3938_v57 = vld [vmem:[%s5233_s15 + $0x274] ss:$28 sps:$4 sm:$0xff]  }
 0x3e1   : > { %2898 = vmatprep.subr.bf16.mxu1 %v3866_v60  ;;  %v3942_v60 = vld [vmem:[%s5233_s15 + $0x238] ss:$28 sps:$4 sm:$0xff]  }
 0x481   : > { %v1842_v49 = vpop.f32.mrf.mxu1 }
 0x482   : > { %v1843_v50 = vadd.f32 %v3288_v48, %v1842_v49  ;;  %v3906_v48 = vld [vmem:[%s5233_s15 + $0x8] ss:$28 sps:$4 sm:$0xff]   ;;  %v3914_v49 = vld [vmem:[%s5233_s15 + $0x354] ss:$28 sps:$4 sm:$0xff]  }
 0x483   : > { %v3575_v51 = vpop.f32.mrf.mxu1 }
 0x484   : > { %v1848_v52 = vmax.f32 %v1843_v50, 0.0  ;;  %v3912_v50 = vld [vmem:[%s5233_s15 + $0x350] ss:$28 sps:$4 sm:$0xff]   ;;  %v3920_v51 = vld [vmem:[%s5233_s15 + $0x31c] ss:$28 sps:$4 sm:$0xff]  }
 0x485   : > { %v1845_v53 = vpop.f32.mrf.mxu1 }
 0x486   : > { %v1866_v54 = vpack.c.bf16 %v1848_v52, %v1848_v52  ;;  %v3918_v52 = vld [vmem:[%s5233_s15 + $0x318] ss:$28 sps:$4 sm:$0xff]   ;;  %v3926_v53 = vld [vmem:[%s5233_s15 + $0x2e4] ss:$28 sps:$4 sm:$0xff]  }
 0x487   : > { %v3576_v55 = vpop.f32.mrf.mxu1 }
 0x488   : > { %3594 = vmatmul.mubr.bf16.vlgmr.msra.gmra.mxu0 %v1866_v54  ;;  %v3924_v54 = vld [vmem:[%s5233_s15 + $0x2e0] ss:$28 sps:$4 sm:$0xff]   ;;  %v3932_v55 = vld [vmem:[%s5233_s15 + $0x2ac] ss:$28 sps:$4 sm:$0xff]  }
 0x489   : > { %2858 = vmatpush1.bf16.msra.mxu0 %v3861_v58  ;;  %v3936_v58 = vld [vmem:[%s5233_s15 + $0x270] ss:$28 sps:$4 sm:$0xff]  }
 0x48a   : > { %2859 = vmatprep.subr.bf16.mxu0 %v3869_v61  ;;  %v3947_v61 = vld [vmem:[%s5233_s15 + $0x1fc] ss:$28 sps:$4 sm:$0xff]  }
 0x48d   : > { %2860 = vmatpush1.bf16.msra.mxu0 %v3867_v62  ;;  %v3950_v62 = vld [vmem:[%s5233_s15 + $0x204] ss:$28 sps:$4 sm:$0xff]  }
 0x48e   : > { %2861 = vmatprep.subr.bf16.mxu0 %v3875_v63  ;;  %v3945_v63 = vld [vmem:[%s5233_s15 + $0x1f8] ss:$28 sps:$4 sm:$0xff]  }
 0x491   : > { %2862 = vmatpush1.bf16.msra.mxu0 %v3873_v0  ;;  %v3948_v0 = vld [vmem:[%s5233_s15 + $0x200] ss:$28 sps:$4 sm:$0xff]  }
 0x492   : > { %2863 = vmatprep.subr.bf16.mxu0 %v3881_v2  ;;  %v3953_v2 = vld [vmem:[%s5233_s15 + $0x1c4] ss:$28 sps:$4 sm:$0xff]  }
 0x495   : > { %2864 = vmatpush1.bf16.msra.mxu0 %v3879_v3  ;;  %v3956_v3 = vld [vmem:[%s5233_s15 + $0x1cc] ss:$28 sps:$4 sm:$0xff]  }
 0x496   : > { %2865 = vmatprep.subr.bf16.mxu0 %v3887_v4  ;;  %v3951_v4 = vld [vmem:[%s5233_s15 + $0x1c0] ss:$28 sps:$4 sm:$0xff]  }
 0x499   : > { %2866 = vmatpush1.bf16.msra.mxu0 %v3885_v5  ;;  %v3954_v5 = vld [vmem:[%s5233_s15 + $0x1c8] ss:$28 sps:$4 sm:$0xff]  }
 0x49a   : > { %2867 = vmatprep.subr.bf16.mxu0 %v3893_v6  ;;  %v3959_v6 = vld [vmem:[%s5233_s15 + $0x19c] ss:$28 sps:$4 sm:$0xff]  }
 0x49d   : > { %2868 = vmatpush1.bf16.msra.mxu0 %v3891_v7  ;;  %v3960_v7 = vld [vmem:[%s5233_s15 + $0x360] ss:$28 sps:$4 sm:$0xff]  }
 0x49e   : > { %2869 = vmatprep.subr.bf16.mxu0 %v3899_v8  ;;  %v1978_v8 = vld [vmem:[%s5232_s14] sm:$0x3] }
 0x4a1   : > { %2870 = vmatpush1.bf16.msra.mxu0 %v3897_v9  ;;  %v1984_v9 = vrot.slane %v1978_v8, %v4604_v16 }
 0x4a2   : > { %2871 = vmatprep.subr.bf16.mxu0 %v3905_v10  ;;  %v1988_v10 = vrot.slane %v1978_v8, %v4610_v18 }
 0x4a5   : > { %2872 = vmatpush1.bf16.msra.mxu0 %v3903_v11 }
 0x4a6   : > { %2873 = vmatprep.subr.bf16.mxu0 %v3911_v12 }
 0x4a9   : > { %2874 = vmatpush2.bf16.msra.mxu0 %v3909_v13 }
 0x4aa   : > { %2875 = vmatprep.subr.bf16.mxu0 %v3917_v14 }
 0x4ad   : > { %2876 = vmatpush2.bf16.msra.mxu0 %v3915_v17 }
 0x4ae   : > { %2877 = vmatprep.subr.bf16.mxu0 %v3923_v20 }
 0x4b1   : > { %2878 = vmatpush2.bf16.msra.mxu0 %v3921_v21 }
 0x4b2   : > { %2879 = vmatprep.subr.bf16.mxu0 %v3929_v22 }
 0x4b5   : > { %2880 = vmatpush2.bf16.msra.mxu0 %v3927_v23 }
 0x4b6   : > { %2881 = vmatprep.subr.bf16.mxu0 %v3935_v24  ;;  %v3957_v24 = vld [vmem:[%s5233_s15 + $0x198] ss:$28 sps:$4 sm:$0xff]  }
 0x4b9   : > { %2882 = vmatpush2.bf16.msra.mxu0 %v3933_v25  ;;  %v3961_v25 = vld [vmem:[%s5233_s15 + $0x1a0] ss:$28 sps:$4 sm:$0xff]  }
 0x4ba   : > { %2883 = vmatprep.subr.bf16.mxu0 %v3941_v26 }
 0x4bd   : > { %2884 = vmatpush2.bf16.msra.mxu0 %v3939_v27  ;;  %v3964_v27 = vld [vmem:[%s5233_s15 + $0x164] ss:$28 sps:$4 sm:$0xff]  }
 0x4be   : > { %2885 = vmatprep.subr.bf16.mxu0 %v3947_v61  ;;  %v4011_v61 = vld [vmem:[%s5233_s15 + $0x27c] ss:$28 sps:$4 sm:$0xff]  }
 0x4c1   : > { %2886 = vmatpush2.bf16.msra.mxu0 %v3945_v63  ;;  %v4014_v63 = vld [vmem:[%s5233_s15 + $0x244] ss:$28 sps:$4 sm:$0xff]  }
 0x4c2   : > { %2887 = vmatprep.subr.bf16.mxu0 %v3953_v2  ;;  %v4017_v2 = vld [vmem:[%s5233_s15 + $0x20c] ss:$28 sps:$4 sm:$0xff]  }
 0x4c5   : > { %2888 = vmatpush2.bf16.msra.mxu0 %v3951_v4  ;;  %v4020_v4 = vld [vmem:[%s5233_s15 + $0x1d4] ss:$28 sps:$4 sm:$0xff]  }
 0x4c6   : > { %2939 = vmatprep.subr.bf16.mxu0 %v3959_v6 }
 0x548   : > { %v1955_v29 = vpop.f32.mrf.mxu0 }
 0x549   : > { %v1956_v30 = vadd.f32 %v3297_v28, %v1955_v29  ;;  %v3965_v28 = vld [vmem:[%s5233_s15 + $0x328] ss:$28 sps:$4 sm:$0xff]   ;;  %v3962_v29 = vld [vmem:[%s5233_s15 + $0x160] ss:$28 sps:$4 sm:$0xff]  }
 0x54a   : > { %v3595_v31 = vpop.f32.mrf.mxu0 }
 0x54b   : > { %v1961_v32 = vmax.f32 %v1956_v30, 0.0  ;;  %v3966_v30 = vld [vmem:[%s5233_s15 + $0x168] ss:$28 sps:$4 sm:$0xff]  }
 0x54c   : > { %v1958_v33 = vpop.f32.mrf.mxu0  ;;  %v3969_v31 = vld [vmem:[%s5233_s15 + $0x12c] ss:$28 sps:$4 sm:$0xff]  }
 0x54d   : > { %v1979_v35 = vpack.c.bf16 %v1961_v32, %v1961_v32  ;;  %v3970_v32 = vld [vmem:[%s5233_s15 + $0x2f0] ss:$28 sps:$4 sm:$0xff]   ;;  %v3967_v33 = vld [vmem:[%s5233_s15 + $0x128] ss:$28 sps:$4 sm:$0xff]  }
 0x54e   : > { %v3596_v19 = vpop.f32.mrf.mxu0 }
 0x54f   : > { %2104 = vmatmul.mubr.bf16.vlgmr.msra.gmra.mxu1 %v1979_v35  ;;  %v3974_v35 = vld [vmem:[%s5233_s15 + $0xf4] ss:$28 sps:$4 sm:$0xff]  }
 0x550   : > { %2899 = vmatpush1.bf16.msra.mxu1 %v3864_v34  ;;  %v3971_v34 = vld [vmem:[%s5233_s15 + $0x130] ss:$28 sps:$4 sm:$0xff]  }
 0x551   : > { %2900 = vmatprep.subr.bf16.mxu1 %v3872_v36  ;;  %v3975_v36 = vld [vmem:[%s5233_s15 + $0x2b8] ss:$28 sps:$4 sm:$0xff]   ;;  %v3972_v19 = vld [vmem:[%s5233_s15 + $0xf0] ss:$28 sps:$4 sm:$0xff]  }
 0x554   : > { %2901 = vmatpush1.bf16.msra.mxu1 %v3870_v37  ;;  %v3976_v37 = vld [vmem:[%s5233_s15 + $0xf8] ss:$28 sps:$4 sm:$0xff]  }
 0x555   : > { %2902 = vmatprep.subr.bf16.mxu1 %v3878_v1  ;;  %v3979_v1 = vld [vmem:[%s5233_s15 + $0xbc] ss:$28 sps:$4 sm:$0xff]  }
 0x558   : > { %2903 = vmatpush1.bf16.msra.mxu1 %v3876_v38  ;;  %v3980_v38 = vld [vmem:[%s5233_s15 + $0x280] ss:$28 sps:$4 sm:$0xff]  }
 0x559   : > { %2904 = vmatprep.subr.bf16.mxu1 %v3884_v39  ;;  %v3977_v39 = vld [vmem:[%s5233_s15 + $0xb8] ss:$28 sps:$4 sm:$0xff]  }
 0x55c   : > { %2905 = vmatpush1.bf16.msra.mxu1 %v3882_v40  ;;  %v3981_v40 = vld [vmem:[%s5233_s15 + $0xc0] ss:$28 sps:$4 sm:$0xff]  }
 0x55d   : > { %2906 = vmatprep.subr.bf16.mxu1 %v3890_v41  ;;  %v3984_v41 = vld [vmem:[%s5233_s15 + $0x84] ss:$28 sps:$4 sm:$0xff]  }
 0x560   : > { %2907 = vmatpush1.bf16.msra.mxu1 %v3888_v42  ;;  %v3985_v42 = vld [vmem:[%s5233_s15 + $0x248] ss:$28 sps:$4 sm:$0xff]  }
 0x561   : > { %2908 = vmatprep.subr.bf16.mxu1 %v3896_v43  ;;  %v3982_v43 = vld [vmem:[%s5233_s15 + $0x80] ss:$28 sps:$4 sm:$0xff]  }
 0x564   : > { %2909 = vmatpush1.bf16.msra.mxu1 %v3894_v44  ;;  %v3986_v44 = vld [vmem:[%s5233_s15 + $0x88] ss:$28 sps:$4 sm:$0xff]  }
 0x565   : > { %2910 = vmatprep.subr.bf16.mxu1 %v3902_v45  ;;  %v3989_v45 = vld [vmem:[%s5233_s15 + $0x4c] ss:$28 sps:$4 sm:$0xff]  }
 0x568   : > { %2911 = vmatpush1.bf16.msra.mxu1 %v3900_v46  ;;  %v3990_v46 = vld [vmem:[%s5233_s15 + $0x210] ss:$28 sps:$4 sm:$0xff]  }
 0x569   : > { %2912 = vmatprep.subr.bf16.mxu1 %v3908_v47  ;;  %v3987_v47 = vld [vmem:[%s5233_s15 + $0x48] ss:$28 sps:$4 sm:$0xff]  }
 0x56c   : > { %2913 = vmatpush1.bf16.msra.mxu1 %v3906_v48  ;;  %v3991_v48 = vld [vmem:[%s5233_s15 + $0x50] ss:$28 sps:$4 sm:$0xff]  }
 0x56d   : > { %2914 = vmatprep.subr.bf16.mxu1 %v3914_v49  ;;  %v3994_v49 = vld [vmem:[%s5233_s15 + $0x14] ss:$28 sps:$4 sm:$0xff]  }
 0x570   : > { %2915 = vmatpush2.bf16.msra.mxu1 %v3912_v50  ;;  %v3995_v50 = vld [vmem:[%s5233_s15 + $0x1d8] ss:$28 sps:$4 sm:$0xff]  }
 0x571   : > { %2916 = vmatprep.subr.bf16.mxu1 %v3920_v51  ;;  %v3992_v51 = vld [vmem:[%s5233_s15 + $0x10] ss:$28 sps:$4 sm:$0xff]  }
 0x574   : > { %2917 = vmatpush2.bf16.msra.mxu1 %v3918_v52  ;;  %v3996_v52 = vld [vmem:[%s5233_s15 + $0x18] ss:$28 sps:$4 sm:$0xff]  }
 0x575   : > { %2918 = vmatprep.subr.bf16.mxu1 %v3926_v53  ;;  %v3999_v53 = vld [vmem:[%s5233_s15 + $0x35c] ss:$28 sps:$4 sm:$0xff]  }
 0x578   : > { %2919 = vmatpush2.bf16.msra.mxu1 %v3924_v54  ;;  %v3997_v54 = vld [vmem:[%s5233_s15 + $0x358] ss:$28 sps:$4 sm:$0xff]  }
 0x579   : > { %2920 = vmatprep.subr.bf16.mxu1 %v3932_v55  ;;  %v4002_v55 = vld [vmem:[%s5233_s15 + $0x324] ss:$28 sps:$4 sm:$0xff]  }
 0x57c   : > { %2921 = vmatpush2.bf16.msra.mxu1 %v3930_v56  ;;  %v4000_v56 = vld [vmem:[%s5233_s15 + $0x320] ss:$28 sps:$4 sm:$0xff]  }
 0x57d   : > { %2922 = vmatprep.subr.bf16.mxu1 %v3938_v57  ;;  %v4005_v57 = vld [vmem:[%s5233_s15 + $0x2ec] ss:$28 sps:$4 sm:$0xff]  }
 0x580   : > { %2923 = vmatpush2.bf16.msra.mxu1 %v3936_v58  ;;  %v4003_v58 = vld [vmem:[%s5233_s15 + $0x2e8] ss:$28 sps:$4 sm:$0xff]  }
 0x581   : > { %2924 = vmatprep.subr.bf16.mxu1 %v3944_v59  ;;  %v4008_v59 = vld [vmem:[%s5233_s15 + $0x2b4] ss:$28 sps:$4 sm:$0xff]  }
 0x584   : > { %2925 = vmatpush2.bf16.msra.mxu1 %v3942_v60  ;;  %v4006_v60 = vld [vmem:[%s5233_s15 + $0x2b0] ss:$28 sps:$4 sm:$0xff]  }
 0x585   : > { %2926 = vmatprep.subr.bf16.mxu1 %v3950_v62  ;;  %v4009_v62 = vld [vmem:[%s5233_s15 + $0x278] ss:$28 sps:$4 sm:$0xff]  }
 0x588   : > { %2927 = vmatpush2.bf16.msra.mxu1 %v3948_v0  ;;  %v4012_v0 = vld [vmem:[%s5233_s15 + $0x240] ss:$28 sps:$4 sm:$0xff]  }
 0x589   : > { %2928 = vmatprep.subr.bf16.mxu1 %v3956_v3  ;;  %v4015_v3 = vld [vmem:[%s5233_s15 + $0x208] ss:$28 sps:$4 sm:$0xff]  }
 0x58c   : > { %2929 = vmatpush2.bf16.msra.mxu1 %v3954_v5  ;;  %v4018_v5 = vld [vmem:[%s5233_s15 + $0x1d0] ss:$28 sps:$4 sm:$0xff]  }
 0x58d   : > { %3495 = vmatprep.subr.bf16.mxu1 %v3960_v7 }
 0x60f   : > { %v2105_v11 = vpop.f32.mrf.mxu1 }
 0x610   : > { %v2106_v12 = vadd.f32 %v2105_v11, %v1984_v9 }
 0x611   : > { %v2107_v13 = vpop.f32.mrf.mxu1 }
 0x612   : > { %v2108_v14 = vadd.f32 %v2107_v13, %v1988_v10  ;;  %v2112_v17 = vmax.f32 %v2106_v12, 0.0 }
 0x613   : > { %v2109_v20 = vpop.f32.mrf.mxu1 }
 0x614   : > { %v2113_v21 = vmax.f32 %v2108_v14, 0.0  ;;  %v5021_v26 = vpack.c.bf16 %v2112_v17, %v2112_v17 }
 0x615   : > { %v2110_v22 = vpop.f32.mrf.mxu1 }
 0x616   : > { %v2244_v23 = vpack.c.bf16 %v2113_v21, %v2113_v21  ;;  %v2272_v22 = vsub.s32 6, %v4601_v15 }
 0x618   : > { %2889 = vmatprep.mubr.bf16.mxu0 %v2244_v23  ;;  %2930 = vmatprep.mubr.bf16.mxu1 %v2244_v23 }
 0x619   : > { %2890 = vmatmul.mubr.bf16.vlgmr.msra.gmra.mxu0 %v5021_v26  ;;  %2931 = vmatmul.mubr.bf16.vlgmr.msra.gmra.mxu1 %v5021_v26 }
 0x61a   : > { %2940 = vmatpush1.bf16.msra.mxu0 %v3957_v24  ;;  %3496 = vmatpush3.bf16.msra.mxu1 %v3961_v25 }
 0x61b   : > { %2971 = vmatprep.mubr.bf16.mxu0 %v2244_v23  ;;  %3012 = vmatprep.mubr.bf16.mxu1 %v2244_v23  ;;  %v2242_v23 = vld [vmem:[%s5234_s16] sm:$0x7f] }
 0x61c   : > { %2941 = vmatprep.subr.bf16.mxu0 %v3964_v27  ;;  %3497 = vmatprep.subr.bf16.mxu1 %v3965_v28  ;;  %v2273_v24 = vrot.slane %v2242_v23, %v2272_v22  ;;  %v2264_v27 = vsub.s32 4, %v4601_v15  ;;  %v2268_v28 = vsub.s32 5, %v4601_v15 }
 0x61e   : > { %2942 = vmatpush1.bf16.msra.mxu0 %v3962_v29  ;;  %3498 = vmatpush3.bf16.msra.mxu1 %v3966_v30 }
 0x61f   : > { %2943 = vmatprep.subr.bf16.mxu0 %v3969_v31  ;;  %3499 = vmatprep.subr.bf16.mxu1 %v3970_v32  ;;  %v2260_v31 = vsub.s32 3, %v4601_v15  ;;  %v2265_v32 = vrot.slane %v2242_v23, %v2264_v27 }
 0x622   : > { %2944 = vmatpush1.bf16.msra.mxu0 %v3967_v33  ;;  %3500 = vmatpush3.bf16.msra.mxu1 %v3971_v34  ;;  %v2249_v33 = vrot.slane %v2242_v23, %v4604_v16  ;;  %v2253_v34 = vrot.slane %v2242_v23, %v4610_v18 }
 0x623   : > { %2945 = vmatprep.subr.bf16.mxu0 %v3974_v35  ;;  %3501 = vmatprep.subr.bf16.mxu1 %v3975_v36  ;;  %v2269_v35 = vrot.slane %v2242_v23, %v2268_v28 }
 0x626   : > { %2946 = vmatpush1.bf16.msra.mxu0 %v3972_v19  ;;  %3502 = vmatpush3.bf16.msra.mxu1 %v3976_v37 }
 0x627   : > { %2947 = vmatprep.subr.bf16.mxu0 %v3979_v1  ;;  %3503 = vmatprep.subr.bf16.mxu1 %v3980_v38  ;;  %v2261_v1 = vrot.slane %v2242_v23, %v2260_v31 }
 0x62a   : > { %2948 = vmatpush1.bf16.msra.mxu0 %v3977_v39  ;;  %3504 = vmatpush3.bf16.msra.mxu1 %v3981_v40 }
 0x62b   : > { %2949 = vmatprep.subr.bf16.mxu0 %v3984_v41  ;;  %3505 = vmatprep.subr.bf16.mxu1 %v3985_v42 }
 0x62e   : > { %2950 = vmatpush1.bf16.msra.mxu0 %v3982_v43  ;;  %3506 = vmatpush3.bf16.msra.mxu1 %v3986_v44 }
 0x62f   : > { %2951 = vmatprep.subr.bf16.mxu0 %v3989_v45  ;;  %3507 = vmatprep.subr.bf16.mxu1 %v3990_v46 }
 0x632   : > { %2952 = vmatpush1.bf16.msra.mxu0 %v3987_v47  ;;  %3508 = vmatpush3.bf16.msra.mxu1 %v3991_v48 }
 0x633   : > { %2953 = vmatprep.subr.bf16.mxu0 %v3994_v49  ;;  %3509 = vmatprep.subr.bf16.mxu1 %v3995_v50 }
 0x636   : > { %2954 = vmatpush1.bf16.msra.mxu0 %v3992_v51  ;;  %3510 = vmatpush3.bf16.msra.mxu1 %v3996_v52 }
 0x637   : > { %2955 = vmatprep.subr.bf16.mxu0 %v3999_v53 }
 0x639   : > { %3013 = vmatmul.mubr.bf16.vlgmr.msra.gmra.mxu1 %v5021_v26 }
 0x63a   : > { %2956 = vmatpush2.bf16.msra.mxu0 %v3997_v54 }
 0x63b   : > { %2957 = vmatprep.subr.bf16.mxu0 %v4002_v55 }
 0x63e   : > { %2958 = vmatpush2.bf16.msra.mxu0 %v4000_v56 }
 0x63f   : > { %2959 = vmatprep.subr.bf16.mxu0 %v4005_v57 }
 0x642   : > { %2960 = vmatpush2.bf16.msra.mxu0 %v4003_v58 }
 0x643   : > { %2961 = vmatprep.subr.bf16.mxu0 %v4008_v59 }
 0x646   : > { %2962 = vmatpush2.bf16.msra.mxu0 %v4006_v60 }
 0x647   : > { %2963 = vmatprep.subr.bf16.mxu0 %v4011_v61 }
 0x64a   : > { %2964 = vmatpush2.bf16.msra.mxu0 %v4009_v62 }
 0x64b   : > { %2965 = vmatprep.subr.bf16.mxu0 %v4014_v63 }
 0x64e   : > { %2966 = vmatpush2.bf16.msra.mxu0 %v4012_v0 }
 0x64f   : > { %2967 = vmatprep.subr.bf16.mxu0 %v4017_v2 }
 0x652   : > { %2968 = vmatpush2.bf16.msra.mxu0 %v4015_v3 }
 0x653   : > { %2969 = vmatprep.subr.bf16.mxu0 %v4020_v4 }
 0x656   : > { %2970 = vmatpush2.bf16.msra.mxu0 %v4018_v5 }
 0x659   : > { %2972 = vmatmul.mubr.bf16.vlgmr.msra.gmra.mxu0 %v5021_v26  ;;  %v2256_v26 = vsub.s32 2, %v4601_v15 }
 0x65b   : > { %v2257_v30 = vrot.slane %v2242_v23, %v2256_v26 }
 0x6d9   : > { %v2891_v6 = vpop.f32.mrf.mxu0  ;;  %v2932_v7 = vpop.f32.mrf.mxu1 }
 0x6da   : > { %v2933_v37 = vadd.f32 %v2932_v7, %v2257_v30  ;;  %v2892_v40 = vadd.f32 %v2891_v6, %v2249_v33 }
 0x6db   : > { %v2893_v8 = vpop.f32.mrf.mxu0  ;;  %v2934_v9 = vpop.f32.mrf.mxu1 }
 0x6dc   : > { %v2894_v41 = vadd.f32 %v2893_v8, %v2253_v34  ;;  %v2935_v45 = vadd.f32 %v2934_v9, %v2261_v1 }
 0x6dd   : > { %v2895_v10 = vpop.f32.mrf.mxu0  ;;  %v2936_v11 = vpop.f32.mrf.mxu1 }
 0x6df   : > { %v2896_v12 = vpop.f32.mrf.mxu0  ;;  %v2937_v13 = vpop.f32.mrf.mxu1 }
 0x6f9   : > { %v3511_v14 = vpop.f32.mrf.mxu1 }
 0x6fb   : > { %v3512_v17 = vpop.f32.mrf.mxu1 }
 0x6fc   : > { %v3513_v25 = vadd.f32 %v3512_v17, %v3511_v14 }
 0x6fd   : > { %v3514_v20 = vpop.f32.mrf.mxu1 }
 0x6fe   : > { %v3015_v29 = vadd.f32 %v3513_v25, %v2273_v24 }
 0x6ff   : > { %v3515_v21 = vpop.f32.mrf.mxu1 }
 0x700   : > { %v3022_v36 = vsel %vm1162_vm0, %v3015_v29, -inf }
 0x701   : > { %v3023_v43 = vmax.f32 %v2933_v37, %v3022_v36 }
 0x703   : > { %v3025_v48 = vmax.f32 %v3023_v43, %v2935_v45 }
 0x719   : > { %v2973_v19 = vpop.f32.mrf.mxu0 }
 0x71a   : > { %v2974_v38 = vadd.f32 %v2973_v19, %v2265_v32 }
 0x71b   : > { %v2975_v39 = vpop.f32.mrf.mxu0 }
 0x71c   : > { %v2976_v42 = vadd.f32 %v2975_v39, %v2269_v35  ;;  %v3020_v15 = vmax.f32 %v2892_v40, %v2974_v38 }
 0x71d   : > { %v2977_v44 = vpop.f32.mrf.mxu0 }
 0x71e   : > { %v3021_v46 = vmax.f32 %v2894_v41, %v2976_v42 }
 0x71f   : > { %v2978_v47 = vpop.f32.mrf.mxu0 }
 0x720   : > { %v3024_v16 = vmax.f32 %v3020_v15, %v3021_v46 }
 0x722   : > { %v3026_v18 = vmax.f32 %v3024_v16, %v3025_v48 }
 0x724   : > { %3027 = vmax.xlane.f32.xlu0 %v3026_v18 }
 0x7ad   : > { %v3028_v49 = vpop.xlane.xlu0 %3027 }
 0x7ae   : > { %v3029_v50 = vsub.f32 %v2892_v40, %v3028_v49  ;;  %v3030_v51 = vsub.f32 %v2894_v41, %v3028_v49  ;;  %v3031_v52 = vsub.f32 %v2933_v37, %v3028_v49  ;;  %v3032_v53 = vsub.f32 %v2935_v45, %v3028_v49 }
 0x7af   : > { %v3033_v56 = vsub.f32 %v2974_v38, %v3028_v49  ;;  %v3035_v58 = vsub.f32 %v3015_v29, %v3028_v49  ;;  %v3034_v59 = vsub.f32 %v2976_v42, %v3028_v49 }
 0x7b0   : > { %v3036_v54 = vmul.f32 1.442695, %v3029_v50  ;;  %v3038_v55 = vmul.f32 1.442695, %v3030_v51  ;;  %v3040_v57 = vmul.f32 1.442695, %v3031_v52 }
 0x7b1   : > { %v3042_v60 = vmul.f32 1.442695, %v3032_v53  ;;  %v3044_v61 = vmul.f32 1.442695, %v3033_v56  ;;  %v3048_v62 = vmul.f32 1.442695, %v3035_v58 }
 0x7b2   : > { %4021 = vpow2.f32 %v3036_v54  ;;  %v3046_v63 = vmul.f32 1.442695, %v3034_v59 }
 0x7b3   : > { %4023 = vpow2.f32 %v3038_v55 }
 0x7b4   : > { %4025 = vpow2.f32 %v3040_v57 }
 0x7b5   : > { %4027 = vpow2.f32 %v3042_v60 }
 0x7b6   : > { %4029 = vpow2.f32 %v3044_v61 }
 0x7b7   : > { %4031 = vpow2.f32 %v3048_v62 }
 0x7b8   : > { %4033 = vpow2.f32 %v3046_v63 }
 0x7bf   : > { %v4022_v0 = vpop.eup %4021 }
 0x7c0   : > { %v4024_v2 = vpop.eup %4023 }
 0x7c1   : > { %v3050_v3 = vadd.f32 %v4024_v2, %v4022_v0  ;;  %v4026_v4 = vpop.eup %4025 }
 0x7c2   : > { %v4028_v6 = vpop.eup %4027 }
 0x7c3   : > { %v3051_v5 = vadd.f32 %v4026_v4, %v3050_v3  ;;  %v4030_v8 = vpop.eup %4029 }
 0x7c4   : > { %v4032_v9 = vpop.eup %4031 }
 0x7c5   : > { %v3052_v7 = vadd.f32 %v4028_v6, %v3051_v5  ;;  %v4034_v11 = vpop.eup %4033  ;;  %v3055_v13 = vsel %vm1162_vm0, %v4032_v9, 0.0 }
 0x7c7   : > { %v3053_v10 = vadd.f32 %v4030_v8, %v3052_v7 }
 0x7c9   : > { %v3054_v12 = vadd.f32 %v4034_v11, %v3053_v10 }
 0x7cb   : > { %v3056_v14 = vadd.f32 %v3055_v13, %v3054_v12 }
 0x7cd   : > { %3057 = vadd.xlane.f32.xlu0 %v3056_v14 }
 0x856   : > { %v3058_v17 = vpop.xlane.xlu0 %3057 }
 0x857   : > { %4035 = vlog2.f32 %v3058_v17 }
 0x864   : > { %v4036_v20 = vpop.eup %4035 }
 0x865   : > { %v3060_v21 = vmul.f32 0.6931472, %v4036_v20 }
 0x867   : > { %v3067_v22 = vsub.f32 %v3035_v58, %v3060_v21  ;;  %v3061_v23 = vsub.f32 %v3029_v50, %v3060_v21  ;;  %v3062_v24 = vsub.f32 %v3030_v51, %v3060_v21  ;;  %v3063_v25 = vsub.f32 %v3031_v52, %v3060_v21 }
 0x868   : > { %v3064_v26 = vsub.f32 %v3032_v53, %v3060_v21  ;;  %v3065_v27 = vsub.f32 %v3033_v56, %v3060_v21  ;;  %v3066_v28 = vsub.f32 %v3034_v59, %v3060_v21 }
 0x869   : > { %3068 = vst [vmem:[%s541_s24] sm:$0xff] %v3061_v23  ;;  %3069 = vst [vmem:[%s541_s24 + $0x8] sm:$0xff] %v3062_v24 }
 0x86a   : > { %3070 = vst [vmem:[%s541_s24 + $0x10] sm:$0xff] %v3063_v25  ;;  %3074 = vst.msk [vmem:[%s541_s24 + $0x30] sm:$0xff] %vm1162_vm0, %v3067_v22 }
 0x86b   : > { %3071 = vst [vmem:[%s541_s24 + $0x18] sm:$0xff] %v3064_v26  ;;  %3072 = vst [vmem:[%s541_s24 + $0x20] sm:$0xff] %v3065_v27 }
 0x86c   : > { %3073 = vst [vmem:[%s541_s24 + $0x28] sm:$0xff] %v3066_v28 }
 0x86d   : > { %4050 = shalt.err (!%p4047_p3)
}
 0x86e   : > { %s4051_s21 = scalar_lea.hbm %s5176_s30, 896  ;;  %s4055_s18 = scalar_lea.hbm %s5257_s19, 1792 }
 0x86f   : > { %p4052_p4 = scmp.ne.s32.totalorder %s5176_s30, %s4051_s21  ;;  %p4056_p9 = scmp.lt.s32.totalorder %s5176_s30, %s5257_s19 }
 0x870   : > { %p4057_p10 = scmp.lt.s32.totalorder %s4055_s18, %s4051_s21 }
 0x871   : > { %p4053_p7 = pnand %p4052_p4, %p4231_p5 }
 0x872   : > { %p4058_p11 = por %p4057_p10, %p4056_p9 }
 0x873   : > { %p4054_p8 = pneg %p4053_p7 }
 0x875   : > { %p4059_p12 = pnand %p4058_p11, %p4054_p8 }
 0x877   : > { %4062 = shalt.err (!%p4059_p12)
}
 0x878   : > { %3600 = dma.vmem_to_hbm [thread:$0]  (%p4231_p5), %s5178_s22, 896, %s5176_s30, %s3076_s28  }
 0x879 PF: > { %s5258_s26 = sld [smem:[#allocation7_spill]] }
 0x87a   : > { %s5259_s27 = sld [smem:[#allocation5_spill]] }
 0x87f   : > { %p3606_p13 = scmp.ge.s32.totalorder %s5258_s26, 2 }
 0x880   : > { %s3102_s20 = sand.u32 1, %s5259_s27  }
 0x881   : > { %p3603_p0 = pnand %p3606_p13, %p4235_p6  ;;  %s3103_s24 = scalar_lea.sflag [#allocation3], %s3102_s20 }
 0x883   : > { %p3604_p1 = pneg %p3603_p0 }
 0x885   : > { %4080 = dma.done.wait (%p3604_p1), %s3103_s24, 896  }
 0x886   : > { %4082 = vsyncadd (%p3604_p1), %s3103_s24, 4294966400  ;;  %s5261_s27 = sld [smem:[#allocation8_spill]]  ;;  %s5264_s24 = smov %s4089_s25 }
 0x887   : > { %s5262_s21 = sld [smem:[#allocation6_spill]] }
 0x888   : > { %s5263_s26 = sld [smem:[#allocation9_spill]] }
 0x88c   : > { %p27_p2 = scmp.ge.s32.totalorder %s5261_s27, 4  }
 0x88d   : > { %s5265_s25 = smov %s5262_s21 }
 0x88e   :  { %29 = sbr.rel (!%p27_p2) target bundleno = 7 (0x7), region = 123 }
 0x893   :  { %3108 = vsyncpa [#allocation3], 1 }
 0x894   :  { %3110 = vsyncpa [#allocation3 + $0x1], 1 }

</bundles_post_ra>
